<compile_context>
chip_gen: v6e
topology: v6e:2x2x1
jax: 0.10.0
libtpu: 0.0.40
codegen_flags: <defaults>
</compile_context>

<pallas_src>
import functools

import jax
import jax.numpy as jnp
import numpy as np
from jax.experimental import pallas as pl
from jax.experimental.pallas import tpu as pltpu

VOCAB = 64     # input_size
HIDDEN = 32    # hidden_size
SEQ_LEN = 8    # number of forward() calls fused into one kernel launch
LANE = 128     # TPU lane width; each gate occupies one full lane block


def encoder_gru_fused_kernel(x_ref, h0_ref, win_ref, bin_ref, wh_ref, bh_ref, out_ref,
                             *, seq_len, lane):
    """Single grid point: whole T-step GRU recurrence, statically unrolled."""
    # Batched input projection for ALL tokens in one MXU op: (T, H) @ (H, 3*lane).
    # r / z input-side biases are pre-summed with the hidden-side biases on the host;
    # the n-gate hidden bias stays on the recurrent side (it is scaled by r).
    gi_all = jnp.dot(x_ref[...], win_ref[...],
                     preferred_element_type=jnp.float32) + bin_ref[...]        # (T, 3*lane)

    h = h0_ref[...]                                                            # (1, lane)
    rows = []
    for t in range(seq_len):                      # static unroll (T is small & fixed)
        gh = jnp.dot(h, wh_ref[...],
                     preferred_element_type=jnp.float32) + bh_ref[...]         # (1, 3*lane)
        gi = gi_all[t:t + 1, :]                                                # (1, 3*lane)

        r = jax.nn.sigmoid(gi[:, 0 * lane:1 * lane] + gh[:, 0 * lane:1 * lane])
        z = jax.nn.sigmoid(gi[:, 1 * lane:2 * lane] + gh[:, 1 * lane:2 * lane])
        n = jnp.tanh(gi[:, 2 * lane:3 * lane] + r * gh[:, 2 * lane:3 * lane])
        h = (1.0 - z) * n + z * h                 # pad lanes stay exactly 0

        rows.append(h)

    out_ref[...] = jnp.concatenate(rows, axis=0)  # one full-tile (T, lane) store


def pack_gru_params(emb, w_ih_t, w_hh_t, b_ih, b_hh, lane=LANE):
    """Pack PyTorch-style GRU params into lane-aligned [r | z | n] gate blocks.

    emb: (V, H); w_ih_t / w_hh_t: (H, 3H) pre-transposed, gate column order [r|z|n];
    b_ih / b_hh: (3H,).
    Returns (w_in (H, 3*lane), b_in (1, 3*lane), w_h (lane, 3*lane), b_h (1, 3*lane)).
    """
    V, H = emb.shape
    assert H <= lane

    def gate(w_t, gi):
        return w_t[:, gi * H:(gi + 1) * H]

    # Input-side projection (applied to all T embeddings at once).
    w_in = jnp.zeros((H, 3 * lane), jnp.float32)
    w_in = w_in.at[:, 0 * lane:0 * lane + H].set(gate(w_ih_t, 0))   # x @ W_ir^T
    w_in = w_in.at[:, 1 * lane:1 * lane + H].set(gate(w_ih_t, 1))   # x @ W_iz^T
    w_in = w_in.at[:, 2 * lane:2 * lane + H].set(gate(w_ih_t, 2))   # x @ W_in^T

    b_in = jnp.zeros((1, 3 * lane), jnp.float32)
    b_in = b_in.at[0, 0 * lane:0 * lane + H].set(b_ih[0:H] + b_hh[0:H])          # r (pre-summed)
    b_in = b_in.at[0, 1 * lane:1 * lane + H].set(b_ih[H:2 * H] + b_hh[H:2 * H])  # z (pre-summed)
    b_in = b_in.at[0, 2 * lane:2 * lane + H].set(b_ih[2 * H:3 * H])              # i_n

    # Recurrent projection: K = lane exactly (h carried as (1, lane), pad lanes zero).
    w_h = jnp.zeros((lane, 3 * lane), jnp.float32)
    w_h = w_h.at[0:H, 0 * lane:0 * lane + H].set(gate(w_hh_t, 0))   # h @ W_hr^T
    w_h = w_h.at[0:H, 1 * lane:1 * lane + H].set(gate(w_hh_t, 1))   # h @ W_hz^T
    w_h = w_h.at[0:H, 2 * lane:2 * lane + H].set(gate(w_hh_t, 2))   # h @ W_hn^T

    b_h = jnp.zeros((1, 3 * lane), jnp.float32)
    b_h = b_h.at[0, 2 * lane:2 * lane + H].set(b_hh[2 * H:3 * H])   # h_n bias (scaled by r)

    return w_in, b_in, w_h, b_h


def encoder_rnn_encode(tokens, hidden0, emb, w_in, b_in, w_h, b_h):
    """Run T fused EncoderRNN.forward() steps.

    Returns (outputs (T, 1, 1, H), hidden (1, 1, H)).
    """
    V, H = emb.shape
    T = int(tokens.shape[0])
    lane = int(w_h.shape[0])

    toks = tokens.astype(jnp.int32)
    x_all = emb[toks]                                              # (T, H) pre-gathered rows
    h0_pad = jnp.zeros((1, lane), jnp.float32).at[:, :H].set(hidden0.reshape(1, H))

    kernel = functools.partial(encoder_gru_fused_kernel, seq_len=T, lane=lane)

    flops = 2 * T * H * 3 * lane + T * (2 * lane * 3 * lane) + T * 12 * lane
    transcendentals = 3 * T * lane
    bytes_accessed = 4 * (T * H + lane + H * 3 * lane + 3 * lane
                          + lane * 3 * lane + 3 * lane + T * lane)

    out_pad = pl.pallas_call(
        kernel,
        out_shape=jax.ShapeDtypeStruct((T, lane), jnp.float32),
        grid_spec=pl.GridSpec(
            grid=(1,),
            in_specs=[
                pl.BlockSpec((T, H), lambda i: (0, 0)),             # pre-gathered embeddings
                pl.BlockSpec((1, lane), lambda i: (0, 0)),          # h0 (read once)
                pl.BlockSpec((H, 3 * lane), lambda i: (0, 0)),      # input-side weights
                pl.BlockSpec((1, 3 * lane), lambda i: (0, 0)),      # input-side biases
                pl.BlockSpec((lane, 3 * lane), lambda i: (0, 0)),   # recurrent weights
                pl.BlockSpec((1, 3 * lane), lambda i: (0, 0)),      # recurrent (n) bias
            ],
            out_specs=pl.BlockSpec((T, lane), lambda i: (0, 0)),    # single lane-dense tile
        ),
        compiler_params=pltpu.CompilerParams(dimension_semantics=("arbitrary",)),
        cost_estimate=pl.CostEstimate(flops=flops,
                                      transcendentals=transcendentals,
                                      bytes_accessed=bytes_accessed),
    )(x_all, h0_pad, w_in, b_in, w_h, b_h)

    outs = out_pad[:, :H]                          # (T, H)
    outputs = outs.reshape(T, 1, 1, H)             # GRU output at every step
    hidden = outs[T - 1].reshape(1, 1, H)          # final hidden state
    return outputs, hidden


def encoder_rnn_forward(token, hidden, emb, w_in, b_in, w_h, b_h):
    """Single-step forward(input, hidden) -> (output, hidden), both (1, 1, H)."""
    outputs, h_new = encoder_rnn_encode(jnp.reshape(token, (1,)), hidden,
                                        emb, w_in, b_in, w_h, b_h)
    return outputs[0], h_new


def ref_encode(tokens, hidden0, emb, w_ih_t, w_hh_t, b_ih, b_hh):
    """Float64 numpy reference matching torch.nn.GRU (gate order r, z, n)."""
    H = emb.shape[1]
    h = np.asarray(hidden0, np.float64).reshape(1, H)
    emb_np = np.asarray(emb, np.float64)
    wi, wh = np.asarray(w_ih_t, np.float64), np.asarray(w_hh_t, np.float64)
    bi, bh = np.asarray(b_ih, np.float64), np.asarray(b_hh, np.float64)
    sig = lambda v: 1.0 / (1.0 + np.exp(-v))
    outs = []
    for t in np.asarray(tokens):
        x = emb_np[int(t)][None, :]
        gi = x @ wi + bi
        gh = h @ wh + bh
        i_r, i_z, i_n = gi[:, :H], gi[:, H:2 * H], gi[:, 2 * H:]
        h_r, h_z, h_n = gh[:, :H], gh[:, H:2 * H], gh[:, 2 * H:]
        r, z = sig(i_r + h_r), sig(i_z + h_z)
        n = np.tanh(i_n + r * h_n)
        h = (1.0 - z) * n + z * h
        outs.append(h.copy())
    return np.stack(outs).reshape(len(outs), 1, 1, H), h.reshape(1, 1, H)


if __name__ == "__main__":
    key = jax.random.PRNGKey(0)
    k_emb, k_wi, k_wh, k_bi, k_bh, k_tok = jax.random.split(key, 6)

    H, V, T = HIDDEN, VOCAB, SEQ_LEN
    bound = 1.0 / np.sqrt(H)

    # nn.Embedding(input_size, hidden_size): N(0, 1) init.
    emb = jax.random.normal(k_emb, (V, H), dtype=jnp.float32)
    # nn.GRU(hidden, hidden): U(-1/sqrt(H), 1/sqrt(H)); stored pre-transposed (H, 3H), gates [r|z|n].
    w_ih_t = jax.random.uniform(k_wi, (H, 3 * H), jnp.float32, -bound, bound)
    w_hh_t = jax.random.uniform(k_wh, (H, 3 * H), jnp.float32, -bound, bound)
    b_ih = jax.random.uniform(k_bi, (3 * H,), jnp.float32, -bound, bound)
    b_hh = jax.random.uniform(k_bh, (3 * H,), jnp.float32, -bound, bound)

    tokens = jax.random.randint(k_tok, (T,), 0, V, dtype=jnp.int32)
    hidden0 = jnp.zeros((1, 1, H), dtype=jnp.float32)              # initHidden()

    w_in, b_in, w_h, b_h = pack_gru_params(emb, w_ih_t, w_hh_t, b_ih, b_hh)

    # Pad-lane invariant: the zero padding of the packed params is what keeps the
    # padded lanes of the carried hidden state at exactly 0.
    assert float(jnp.max(jnp.abs(w_h[H:, :]))) == 0.0
    assert float(jnp.max(jnp.abs(w_in[:, H:LANE]))) == 0.0
    assert float(jnp.max(jnp.abs(b_in[:, H:LANE]))) == 0.0
    assert float(jnp.max(jnp.abs(b_h[:, 0:2 * LANE]))) == 0.0

    # Fused encode: T forward() calls in a single pallas_call / single grid point.
    outputs, hidden_T = encoder_rnn_encode(tokens, hidden0, emb, w_in, b_in, w_h, b_h)
    outputs = jax.block_until_ready(outputs)
    hidden_T = jax.block_until_ready(hidden_T)

    ref_outs, ref_hid = ref_encode(tokens, hidden0, emb, w_ih_t, w_hh_t, b_ih, b_hh)
    assert outputs.shape == (T, 1, 1, H) and hidden_T.shape == (1, 1, H)
    np.testing.assert_allclose(np.asarray(outputs), ref_outs, atol=1e-5, rtol=1e-5)
    np.testing.assert_allclose(np.asarray(hidden_T), ref_hid, atol=1e-5, rtol=1e-5)

    # Single-step forward() — exact module semantics: (output, hidden), output == hidden.
    out1, hid1 = encoder_rnn_forward(tokens[0:1], hidden0, emb, w_in, b_in, w_h, b_h)
    out1 = jax.block_until_ready(out1)
    hid1 = jax.block_until_ready(hid1)
    assert out1.shape == (1, 1, H) and hid1.shape == (1, 1, H)
    np.testing.assert_allclose(np.asarray(out1), ref_outs[0], atol=1e-5, rtol=1e-5)
    np.testing.assert_allclose(np.asarray(hid1), ref_outs[0], atol=1e-5, rtol=1e-5)

    print("KERNEL_OK")
</pallas_src>

<mosaic_0001>
module attributes {stable_mosaic.version = 11 : i64} {
  func.func @encoder_gru_fused_kernel(%arg0: i32, %arg1: memref<8x32xf32, #tpu.memory_space<vmem>>, %arg2: memref<1x128xf32, #tpu.memory_space<vmem>>, %arg3: memref<32x384xf32, #tpu.memory_space<vmem>>, %arg4: memref<1x384xf32, #tpu.memory_space<vmem>>, %arg5: memref<128x384xf32, #tpu.memory_space<vmem>>, %arg6: memref<1x384xf32, #tpu.memory_space<vmem>>, %arg7: memref<8x128xf32, #tpu.memory_space<vmem>>) attributes {dimension_semantics = [#tpu.dimension_semantics<arbitrary>], iteration_bounds = array<i64: 1>, scalar_prefetch = 0 : i64, scratch_operands = 0 : i64, tpu.core_type = #tpu.core_type<tc>, window_params = [{pipeline_mode = #tpu.pipeline_mode<synchronous>, transform_indices = @transform_0, window_bounds = array<i64: 8, 32>}, {pipeline_mode = #tpu.pipeline_mode<synchronous>, transform_indices = @transform_1, window_bounds = array<i64: 1, 128>}, {pipeline_mode = #tpu.pipeline_mode<synchronous>, transform_indices = @transform_2, window_bounds = array<i64: 32, 384>}, {pipeline_mode = #tpu.pipeline_mode<synchronous>, transform_indices = @transform_3, window_bounds = array<i64: 1, 384>}, {pipeline_mode = #tpu.pipeline_mode<synchronous>, transform_indices = @transform_4, window_bounds = array<i64: 128, 384>}, {pipeline_mode = #tpu.pipeline_mode<synchronous>, transform_indices = @transform_5, window_bounds = array<i64: 1, 384>}, {pipeline_mode = #tpu.pipeline_mode<synchronous>, transform_indices = @transform_6, window_bounds = array<i64: 8, 128>}]} {
    %c0 = arith.constant 0 : index
    %c0_0 = arith.constant 0 : index
    %0 = vector.load %arg1[%c0, %c0_0] : memref<8x32xf32, #tpu.memory_space<vmem>>, vector<8x32xf32>
    %c0_1 = arith.constant 0 : index
    %c0_2 = arith.constant 0 : index
    %1 = vector.load %arg3[%c0_1, %c0_2] : memref<32x384xf32, #tpu.memory_space<vmem>>, vector<32x384xf32>
    %cst = arith.constant dense<0.000000e+00> : vector<8x384xf32>
    %2 = tpu.matmul %0, %1, %cst {dimension_numbers = #tpu.dot_dimension_numbers<[1], [0], [0], [1], [0, 0, 1, 1], [], []>} : vector<8x32xf32>, vector<32x384xf32>, vector<8x384xf32> -> vector<8x384xf32>
    %c0_3 = arith.constant 0 : index
    %c0_4 = arith.constant 0 : index
    %3 = vector.load %arg4[%c0_3, %c0_4] : memref<1x384xf32, #tpu.memory_space<vmem>>, vector<1x384xf32>
    %4 = vector.broadcast %3 : vector<1x384xf32> to vector<8x384xf32>
    %5 = arith.addf %2, %4 : vector<8x384xf32>
    %c0_5 = arith.constant 0 : index
    %c0_6 = arith.constant 0 : index
    %6 = vector.load %arg2[%c0_5, %c0_6] : memref<1x128xf32, #tpu.memory_space<vmem>>, vector<1x128xf32>
    %c0_7 = arith.constant 0 : index
    %c0_8 = arith.constant 0 : index
    %7 = vector.load %arg5[%c0_7, %c0_8] : memref<128x384xf32, #tpu.memory_space<vmem>>, vector<128x384xf32>
    %cst_9 = arith.constant dense<0.000000e+00> : vector<1x384xf32>
    %8 = tpu.matmul %6, %7, %cst_9 {dimension_numbers = #tpu.dot_dimension_numbers<[1], [0], [0], [1], [0, 0, 1, 1], [], []>} : vector<1x128xf32>, vector<128x384xf32>, vector<1x384xf32> -> vector<1x384xf32>
    %c0_10 = arith.constant 0 : index
    %c0_11 = arith.constant 0 : index
    %9 = vector.load %arg6[%c0_10, %c0_11] : memref<1x384xf32, #tpu.memory_space<vmem>>, vector<1x384xf32>
    %10 = arith.addf %8, %9 : vector<1x384xf32>
    %11 = vector.extract_strided_slice %5 {offsets = [0, 0], sizes = [1, 384], strides = [1, 1]} : vector<8x384xf32> to vector<1x384xf32>
    %12 = vector.extract_strided_slice %11 {offsets = [0, 0], sizes = [1, 128], strides = [1, 1]} : vector<1x384xf32> to vector<1x128xf32>
    %13 = vector.extract_strided_slice %10 {offsets = [0, 0], sizes = [1, 128], strides = [1, 1]} : vector<1x384xf32> to vector<1x128xf32>
    %14 = arith.addf %12, %13 : vector<1x128xf32>
    %15 = arith.negf %14 : vector<1x128xf32>
    %16 = math.exp %15 : vector<1x128xf32>
    %cst_12 = arith.constant 1.000000e+00 : f32
    %17 = vector.broadcast %cst_12 : f32 to vector<1x128xf32>
    %18 = arith.addf %17, %16 : vector<1x128xf32>
    %19 = arith.divf %17, %18 : vector<1x128xf32>
    %20 = vector.extract_strided_slice %11 {offsets = [0, 128], sizes = [1, 128], strides = [1, 1]} : vector<1x384xf32> to vector<1x128xf32>
    %21 = vector.extract_strided_slice %10 {offsets = [0, 128], sizes = [1, 128], strides = [1, 1]} : vector<1x384xf32> to vector<1x128xf32>
    %22 = arith.addf %20, %21 : vector<1x128xf32>
    %23 = arith.negf %22 : vector<1x128xf32>
    %24 = math.exp %23 : vector<1x128xf32>
    %cst_13 = arith.constant 1.000000e+00 : f32
    %25 = vector.broadcast %cst_13 : f32 to vector<1x128xf32>
    %26 = arith.addf %25, %24 : vector<1x128xf32>
    %27 = arith.divf %25, %26 : vector<1x128xf32>
    %28 = vector.extract_strided_slice %11 {offsets = [0, 256], sizes = [1, 128], strides = [1, 1]} : vector<1x384xf32> to vector<1x128xf32>
    %29 = vector.extract_strided_slice %10 {offsets = [0, 256], sizes = [1, 128], strides = [1, 1]} : vector<1x384xf32> to vector<1x128xf32>
    %30 = arith.mulf %19, %29 : vector<1x128xf32>
    %31 = arith.addf %28, %30 : vector<1x128xf32>
    %32 = math.tanh %31 : vector<1x128xf32>
    %cst_14 = arith.constant 1.000000e+00 : f32
    %33 = vector.broadcast %cst_14 : f32 to vector<1x128xf32>
    %34 = arith.subf %33, %27 : vector<1x128xf32>
    %35 = arith.mulf %34, %32 : vector<1x128xf32>
    %36 = arith.mulf %27, %6 : vector<1x128xf32>
    %37 = arith.addf %35, %36 : vector<1x128xf32>
    %c0_15 = arith.constant 0 : index
    %c0_16 = arith.constant 0 : index
    %38 = vector.load %arg5[%c0_15, %c0_16] : memref<128x384xf32, #tpu.memory_space<vmem>>, vector<128x384xf32>
    %cst_17 = arith.constant dense<0.000000e+00> : vector<1x384xf32>
    %39 = tpu.matmul %37, %38, %cst_17 {dimension_numbers = #tpu.dot_dimension_numbers<[1], [0], [0], [1], [0, 0, 1, 1], [], []>} : vector<1x128xf32>, vector<128x384xf32>, vector<1x384xf32> -> vector<1x384xf32>
    %c0_18 = arith.constant 0 : index
    %c0_19 = arith.constant 0 : index
    %40 = vector.load %arg6[%c0_18, %c0_19] : memref<1x384xf32, #tpu.memory_space<vmem>>, vector<1x384xf32>
    %41 = arith.addf %39, %40 : vector<1x384xf32>
    %42 = vector.extract_strided_slice %5 {offsets = [1, 0], sizes = [1, 384], strides = [1, 1]} : vector<8x384xf32> to vector<1x384xf32>
    %43 = vector.extract_strided_slice %42 {offsets = [0, 0], sizes = [1, 128], strides = [1, 1]} : vector<1x384xf32> to vector<1x128xf32>
    %44 = vector.extract_strided_slice %41 {offsets = [0, 0], sizes = [1, 128], strides = [1, 1]} : vector<1x384xf32> to vector<1x128xf32>
    %45 = arith.addf %43, %44 : vector<1x128xf32>
    %46 = arith.negf %45 : vector<1x128xf32>
    %47 = math.exp %46 : vector<1x128xf32>
    %cst_20 = arith.constant 1.000000e+00 : f32
    %48 = vector.broadcast %cst_20 : f32 to vector<1x128xf32>
    %49 = arith.addf %48, %47 : vector<1x128xf32>
    %50 = arith.divf %48, %49 : vector<1x128xf32>
    %51 = vector.extract_strided_slice %42 {offsets = [0, 128], sizes = [1, 128], strides = [1, 1]} : vector<1x384xf32> to vector<1x128xf32>
    %52 = vector.extract_strided_slice %41 {offsets = [0, 128], sizes = [1, 128], strides = [1, 1]} : vector<1x384xf32> to vector<1x128xf32>
    %53 = arith.addf %51, %52 : vector<1x128xf32>
    %54 = arith.negf %53 : vector<1x128xf32>
    %55 = math.exp %54 : vector<1x128xf32>
    %cst_21 = arith.constant 1.000000e+00 : f32
    %56 = vector.broadcast %cst_21 : f32 to vector<1x128xf32>
    %57 = arith.addf %56, %55 : vector<1x128xf32>
    %58 = arith.divf %56, %57 : vector<1x128xf32>
    %59 = vector.extract_strided_slice %42 {offsets = [0, 256], sizes = [1, 128], strides = [1, 1]} : vector<1x384xf32> to vector<1x128xf32>
    %60 = vector.extract_strided_slice %41 {offsets = [0, 256], sizes = [1, 128], strides = [1, 1]} : vector<1x384xf32> to vector<1x128xf32>
    %61 = arith.mulf %50, %60 : vector<1x128xf32>
    %62 = arith.addf %59, %61 : vector<1x128xf32>
    %63 = math.tanh %62 : vector<1x128xf32>
    %cst_22 = arith.constant 1.000000e+00 : f32
    %64 = vector.broadcast %cst_22 : f32 to vector<1x128xf32>
    %65 = arith.subf %64, %58 : vector<1x128xf32>
    %66 = arith.mulf %65, %63 : vector<1x128xf32>
    %67 = arith.mulf %58, %37 : vector<1x128xf32>
    %68 = arith.addf %66, %67 : vector<1x128xf32>
    %c0_23 = arith.constant 0 : index
    %c0_24 = arith.constant 0 : index
    %69 = vector.load %arg5[%c0_23, %c0_24] : memref<128x384xf32, #tpu.memory_space<vmem>>, vector<128x384xf32>
    %cst_25 = arith.constant dense<0.000000e+00> : vector<1x384xf32>
    %70 = tpu.matmul %68, %69, %cst_25 {dimension_numbers = #tpu.dot_dimension_numbers<[1], [0], [0], [1], [0, 0, 1, 1], [], []>} : vector<1x128xf32>, vector<128x384xf32>, vector<1x384xf32> -> vector<1x384xf32>
    %c0_26 = arith.constant 0 : index
    %c0_27 = arith.constant 0 : index
    %71 = vector.load %arg6[%c0_26, %c0_27] : memref<1x384xf32, #tpu.memory_space<vmem>>, vector<1x384xf32>
    %72 = arith.addf %70, %71 : vector<1x384xf32>
    %73 = vector.extract_strided_slice %5 {offsets = [2, 0], sizes = [1, 384], strides = [1, 1]} : vector<8x384xf32> to vector<1x384xf32>
    %74 = vector.extract_strided_slice %73 {offsets = [0, 0], sizes = [1, 128], strides = [1, 1]} : vector<1x384xf32> to vector<1x128xf32>
    %75 = vector.extract_strided_slice %72 {offsets = [0, 0], sizes = [1, 128], strides = [1, 1]} : vector<1x384xf32> to vector<1x128xf32>
    %76 = arith.addf %74, %75 : vector<1x128xf32>
    %77 = arith.negf %76 : vector<1x128xf32>
    %78 = math.exp %77 : vector<1x128xf32>
    %cst_28 = arith.constant 1.000000e+00 : f32
    %79 = vector.broadcast %cst_28 : f32 to vector<1x128xf32>
    %80 = arith.addf %79, %78 : vector<1x128xf32>
    %81 = arith.divf %79, %80 : vector<1x128xf32>
    %82 = vector.extract_strided_slice %73 {offsets = [0, 128], sizes = [1, 128], strides = [1, 1]} : vector<1x384xf32> to vector<1x128xf32>
    %83 = vector.extract_strided_slice %72 {offsets = [0, 128], sizes = [1, 128], strides = [1, 1]} : vector<1x384xf32> to vector<1x128xf32>
    %84 = arith.addf %82, %83 : vector<1x128xf32>
    %85 = arith.negf %84 : vector<1x128xf32>
    %86 = math.exp %85 : vector<1x128xf32>
    %cst_29 = arith.constant 1.000000e+00 : f32
    %87 = vector.broadcast %cst_29 : f32 to vector<1x128xf32>
    %88 = arith.addf %87, %86 : vector<1x128xf32>
    %89 = arith.divf %87, %88 : vector<1x128xf32>
    %90 = vector.extract_strided_slice %73 {offsets = [0, 256], sizes = [1, 128], strides = [1, 1]} : vector<1x384xf32> to vector<1x128xf32>
    %91 = vector.extract_strided_slice %72 {offsets = [0, 256], sizes = [1, 128], strides = [1, 1]} : vector<1x384xf32> to vector<1x128xf32>
    %92 = arith.mulf %81, %91 : vector<1x128xf32>
    %93 = arith.addf %90, %92 : vector<1x128xf32>
    %94 = math.tanh %93 : vector<1x128xf32>
    %cst_30 = arith.constant 1.000000e+00 : f32
    %95 = vector.broadcast %cst_30 : f32 to vector<1x128xf32>
    %96 = arith.subf %95, %89 : vector<1x128xf32>
    %97 = arith.mulf %96, %94 : vector<1x128xf32>
    %98 = arith.mulf %89, %68 : vector<1x128xf32>
    %99 = arith.addf %97, %98 : vector<1x128xf32>
    %c0_31 = arith.constant 0 : index
    %c0_32 = arith.constant 0 : index
    %100 = vector.load %arg5[%c0_31, %c0_32] : memref<128x384xf32, #tpu.memory_space<vmem>>, vector<128x384xf32>
    %cst_33 = arith.constant dense<0.000000e+00> : vector<1x384xf32>
    %101 = tpu.matmul %99, %100, %cst_33 {dimension_numbers = #tpu.dot_dimension_numbers<[1], [0], [0], [1], [0, 0, 1, 1], [], []>} : vector<1x128xf32>, vector<128x384xf32>, vector<1x384xf32> -> vector<1x384xf32>
    %c0_34 = arith.constant 0 : index
    %c0_35 = arith.constant 0 : index
    %102 = vector.load %arg6[%c0_34, %c0_35] : memref<1x384xf32, #tpu.memory_space<vmem>>, vector<1x384xf32>
    %103 = arith.addf %101, %102 : vector<1x384xf32>
    %104 = vector.extract_strided_slice %5 {offsets = [3, 0], sizes = [1, 384], strides = [1, 1]} : vector<8x384xf32> to vector<1x384xf32>
    %105 = vector.extract_strided_slice %104 {offsets = [0, 0], sizes = [1, 128], strides = [1, 1]} : vector<1x384xf32> to vector<1x128xf32>
    %106 = vector.extract_strided_slice %103 {offsets = [0, 0], sizes = [1, 128], strides = [1, 1]} : vector<1x384xf32> to vector<1x128xf32>
    %107 = arith.addf %105, %106 : vector<1x128xf32>
    %108 = arith.negf %107 : vector<1x128xf32>
    %109 = math.exp %108 : vector<1x128xf32>
    %cst_36 = arith.constant 1.000000e+00 : f32
    %110 = vector.broadcast %cst_36 : f32 to vector<1x128xf32>
    %111 = arith.addf %110, %109 : vector<1x128xf32>
    %112 = arith.divf %110, %111 : vector<1x128xf32>
    %113 = vector.extract_strided_slice %104 {offsets = [0, 128], sizes = [1, 128], strides = [1, 1]} : vector<1x384xf32> to vector<1x128xf32>
    %114 = vector.extract_strided_slice %103 {offsets = [0, 128], sizes = [1, 128], strides = [1, 1]} : vector<1x384xf32> to vector<1x128xf32>
    %115 = arith.addf %113, %114 : vector<1x128xf32>
    %116 = arith.negf %115 : vector<1x128xf32>
    %117 = math.exp %116 : vector<1x128xf32>
    %cst_37 = arith.constant 1.000000e+00 : f32
    %118 = vector.broadcast %cst_37 : f32 to vector<1x128xf32>
    %119 = arith.addf %118, %117 : vector<1x128xf32>
    %120 = arith.divf %118, %119 : vector<1x128xf32>
    %121 = vector.extract_strided_slice %104 {offsets = [0, 256], sizes = [1, 128], strides = [1, 1]} : vector<1x384xf32> to vector<1x128xf32>
    %122 = vector.extract_strided_slice %103 {offsets = [0, 256], sizes = [1, 128], strides = [1, 1]} : vector<1x384xf32> to vector<1x128xf32>
    %123 = arith.mulf %112, %122 : vector<1x128xf32>
    %124 = arith.addf %121, %123 : vector<1x128xf32>
    %125 = math.tanh %124 : vector<1x128xf32>
    %cst_38 = arith.constant 1.000000e+00 : f32
    %126 = vector.broadcast %cst_38 : f32 to vector<1x128xf32>
    %127 = arith.subf %126, %120 : vector<1x128xf32>
    %128 = arith.mulf %127, %125 : vector<1x128xf32>
    %129 = arith.mulf %120, %99 : vector<1x128xf32>
    %130 = arith.addf %128, %129 : vector<1x128xf32>
    %c0_39 = arith.constant 0 : index
    %c0_40 = arith.constant 0 : index
    %131 = vector.load %arg5[%c0_39, %c0_40] : memref<128x384xf32, #tpu.memory_space<vmem>>, vector<128x384xf32>
    %cst_41 = arith.constant dense<0.000000e+00> : vector<1x384xf32>
    %132 = tpu.matmul %130, %131, %cst_41 {dimension_numbers = #tpu.dot_dimension_numbers<[1], [0], [0], [1], [0, 0, 1, 1], [], []>} : vector<1x128xf32>, vector<128x384xf32>, vector<1x384xf32> -> vector<1x384xf32>
    %c0_42 = arith.constant 0 : index
    %c0_43 = arith.constant 0 : index
    %133 = vector.load %arg6[%c0_42, %c0_43] : memref<1x384xf32, #tpu.memory_space<vmem>>, vector<1x384xf32>
    %134 = arith.addf %132, %133 : vector<1x384xf32>
    %135 = vector.extract_strided_slice %5 {offsets = [4, 0], sizes = [1, 384], strides = [1, 1]} : vector<8x384xf32> to vector<1x384xf32>
    %136 = vector.extract_strided_slice %135 {offsets = [0, 0], sizes = [1, 128], strides = [1, 1]} : vector<1x384xf32> to vector<1x128xf32>
    %137 = vector.extract_strided_slice %134 {offsets = [0, 0], sizes = [1, 128], strides = [1, 1]} : vector<1x384xf32> to vector<1x128xf32>
    %138 = arith.addf %136, %137 : vector<1x128xf32>
    %139 = arith.negf %138 : vector<1x128xf32>
    %140 = math.exp %139 : vector<1x128xf32>
    %cst_44 = arith.constant 1.000000e+00 : f32
    %141 = vector.broadcast %cst_44 : f32 to vector<1x128xf32>
    %142 = arith.addf %141, %140 : vector<1x128xf32>
    %143 = arith.divf %141, %142 : vector<1x128xf32>
    %144 = vector.extract_strided_slice %135 {offsets = [0, 128], sizes = [1, 128], strides = [1, 1]} : vector<1x384xf32> to vector<1x128xf32>
    %145 = vector.extract_strided_slice %134 {offsets = [0, 128], sizes = [1, 128], strides = [1, 1]} : vector<1x384xf32> to vector<1x128xf32>
    %146 = arith.addf %144, %145 : vector<1x128xf32>
    %147 = arith.negf %146 : vector<1x128xf32>
    %148 = math.exp %147 : vector<1x128xf32>
    %cst_45 = arith.constant 1.000000e+00 : f32
    %149 = vector.broadcast %cst_45 : f32 to vector<1x128xf32>
    %150 = arith.addf %149, %148 : vector<1x128xf32>
    %151 = arith.divf %149, %150 : vector<1x128xf32>
    %152 = vector.extract_strided_slice %135 {offsets = [0, 256], sizes = [1, 128], strides = [1, 1]} : vector<1x384xf32> to vector<1x128xf32>
    %153 = vector.extract_strided_slice %134 {offsets = [0, 256], sizes = [1, 128], strides = [1, 1]} : vector<1x384xf32> to vector<1x128xf32>
    %154 = arith.mulf %143, %153 : vector<1x128xf32>
    %155 = arith.addf %152, %154 : vector<1x128xf32>
    %156 = math.tanh %155 : vector<1x128xf32>
    %cst_46 = arith.constant 1.000000e+00 : f32
    %157 = vector.broadcast %cst_46 : f32 to vector<1x128xf32>
    %158 = arith.subf %157, %151 : vector<1x128xf32>
    %159 = arith.mulf %158, %156 : vector<1x128xf32>
    %160 = arith.mulf %151, %130 : vector<1x128xf32>
    %161 = arith.addf %159, %160 : vector<1x128xf32>
    %c0_47 = arith.constant 0 : index
    %c0_48 = arith.constant 0 : index
    %162 = vector.load %arg5[%c0_47, %c0_48] : memref<128x384xf32, #tpu.memory_space<vmem>>, vector<128x384xf32>
    %cst_49 = arith.constant dense<0.000000e+00> : vector<1x384xf32>
    %163 = tpu.matmul %161, %162, %cst_49 {dimension_numbers = #tpu.dot_dimension_numbers<[1], [0], [0], [1], [0, 0, 1, 1], [], []>} : vector<1x128xf32>, vector<128x384xf32>, vector<1x384xf32> -> vector<1x384xf32>
    %c0_50 = arith.constant 0 : index
    %c0_51 = arith.constant 0 : index
    %164 = vector.load %arg6[%c0_50, %c0_51] : memref<1x384xf32, #tpu.memory_space<vmem>>, vector<1x384xf32>
    %165 = arith.addf %163, %164 : vector<1x384xf32>
    %166 = vector.extract_strided_slice %5 {offsets = [5, 0], sizes = [1, 384], strides = [1, 1]} : vector<8x384xf32> to vector<1x384xf32>
    %167 = vector.extract_strided_slice %166 {offsets = [0, 0], sizes = [1, 128], strides = [1, 1]} : vector<1x384xf32> to vector<1x128xf32>
    %168 = vector.extract_strided_slice %165 {offsets = [0, 0], sizes = [1, 128], strides = [1, 1]} : vector<1x384xf32> to vector<1x128xf32>
    %169 = arith.addf %167, %168 : vector<1x128xf32>
    %170 = arith.negf %169 : vector<1x128xf32>
    %171 = math.exp %170 : vector<1x128xf32>
    %cst_52 = arith.constant 1.000000e+00 : f32
    %172 = vector.broadcast %cst_52 : f32 to vector<1x128xf32>
    %173 = arith.addf %172, %171 : vector<1x128xf32>
    %174 = arith.divf %172, %173 : vector<1x128xf32>
    %175 = vector.extract_strided_slice %166 {offsets = [0, 128], sizes = [1, 128], strides = [1, 1]} : vector<1x384xf32> to vector<1x128xf32>
    %176 = vector.extract_strided_slice %165 {offsets = [0, 128], sizes = [1, 128], strides = [1, 1]} : vector<1x384xf32> to vector<1x128xf32>
    %177 = arith.addf %175, %176 : vector<1x128xf32>
    %178 = arith.negf %177 : vector<1x128xf32>
    %179 = math.exp %178 : vector<1x128xf32>
    %cst_53 = arith.constant 1.000000e+00 : f32
    %180 = vector.broadcast %cst_53 : f32 to vector<1x128xf32>
    %181 = arith.addf %180, %179 : vector<1x128xf32>
    %182 = arith.divf %180, %181 : vector<1x128xf32>
    %183 = vector.extract_strided_slice %166 {offsets = [0, 256], sizes = [1, 128], strides = [1, 1]} : vector<1x384xf32> to vector<1x128xf32>
    %184 = vector.extract_strided_slice %165 {offsets = [0, 256], sizes = [1, 128], strides = [1, 1]} : vector<1x384xf32> to vector<1x128xf32>
    %185 = arith.mulf %174, %184 : vector<1x128xf32>
    %186 = arith.addf %183, %185 : vector<1x128xf32>
    %187 = math.tanh %186 : vector<1x128xf32>
    %cst_54 = arith.constant 1.000000e+00 : f32
    %188 = vector.broadcast %cst_54 : f32 to vector<1x128xf32>
    %189 = arith.subf %188, %182 : vector<1x128xf32>
    %190 = arith.mulf %189, %187 : vector<1x128xf32>
    %191 = arith.mulf %182, %161 : vector<1x128xf32>
    %192 = arith.addf %190, %191 : vector<1x128xf32>
    %c0_55 = arith.constant 0 : index
    %c0_56 = arith.constant 0 : index
    %193 = vector.load %arg5[%c0_55, %c0_56] : memref<128x384xf32, #tpu.memory_space<vmem>>, vector<128x384xf32>
    %cst_57 = arith.constant dense<0.000000e+00> : vector<1x384xf32>
    %194 = tpu.matmul %192, %193, %cst_57 {dimension_numbers = #tpu.dot_dimension_numbers<[1], [0], [0], [1], [0, 0, 1, 1], [], []>} : vector<1x128xf32>, vector<128x384xf32>, vector<1x384xf32> -> vector<1x384xf32>
    %c0_58 = arith.constant 0 : index
    %c0_59 = arith.constant 0 : index
    %195 = vector.load %arg6[%c0_58, %c0_59] : memref<1x384xf32, #tpu.memory_space<vmem>>, vector<1x384xf32>
    %196 = arith.addf %194, %195 : vector<1x384xf32>
    %197 = vector.extract_strided_slice %5 {offsets = [6, 0], sizes = [1, 384], strides = [1, 1]} : vector<8x384xf32> to vector<1x384xf32>
    %198 = vector.extract_strided_slice %197 {offsets = [0, 0], sizes = [1, 128], strides = [1, 1]} : vector<1x384xf32> to vector<1x128xf32>
    %199 = vector.extract_strided_slice %196 {offsets = [0, 0], sizes = [1, 128], strides = [1, 1]} : vector<1x384xf32> to vector<1x128xf32>
    %200 = arith.addf %198, %199 : vector<1x128xf32>
    %201 = arith.negf %200 : vector<1x128xf32>
    %202 = math.exp %201 : vector<1x128xf32>
    %cst_60 = arith.constant 1.000000e+00 : f32
    %203 = vector.broadcast %cst_60 : f32 to vector<1x128xf32>
    %204 = arith.addf %203, %202 : vector<1x128xf32>
    %205 = arith.divf %203, %204 : vector<1x128xf32>
    %206 = vector.extract_strided_slice %197 {offsets = [0, 128], sizes = [1, 128], strides = [1, 1]} : vector<1x384xf32> to vector<1x128xf32>
    %207 = vector.extract_strided_slice %196 {offsets = [0, 128], sizes = [1, 128], strides = [1, 1]} : vector<1x384xf32> to vector<1x128xf32>
    %208 = arith.addf %206, %207 : vector<1x128xf32>
    %209 = arith.negf %208 : vector<1x128xf32>
    %210 = math.exp %209 : vector<1x128xf32>
    %cst_61 = arith.constant 1.000000e+00 : f32
    %211 = vector.broadcast %cst_61 : f32 to vector<1x128xf32>
    %212 = arith.addf %211, %210 : vector<1x128xf32>
    %213 = arith.divf %211, %212 : vector<1x128xf32>
    %214 = vector.extract_strided_slice %197 {offsets = [0, 256], sizes = [1, 128], strides = [1, 1]} : vector<1x384xf32> to vector<1x128xf32>
    %215 = vector.extract_strided_slice %196 {offsets = [0, 256], sizes = [1, 128], strides = [1, 1]} : vector<1x384xf32> to vector<1x128xf32>
    %216 = arith.mulf %205, %215 : vector<1x128xf32>
    %217 = arith.addf %214, %216 : vector<1x128xf32>
    %218 = math.tanh %217 : vector<1x128xf32>
    %cst_62 = arith.constant 1.000000e+00 : f32
    %219 = vector.broadcast %cst_62 : f32 to vector<1x128xf32>
    %220 = arith.subf %219, %213 : vector<1x128xf32>
    %221 = arith.mulf %220, %218 : vector<1x128xf32>
    %222 = arith.mulf %213, %192 : vector<1x128xf32>
    %223 = arith.addf %221, %222 : vector<1x128xf32>
    %c0_63 = arith.constant 0 : index
    %c0_64 = arith.constant 0 : index
    %224 = vector.load %arg5[%c0_63, %c0_64] : memref<128x384xf32, #tpu.memory_space<vmem>>, vector<128x384xf32>
    %cst_65 = arith.constant dense<0.000000e+00> : vector<1x384xf32>
    %225 = tpu.matmul %223, %224, %cst_65 {dimension_numbers = #tpu.dot_dimension_numbers<[1], [0], [0], [1], [0, 0, 1, 1], [], []>} : vector<1x128xf32>, vector<128x384xf32>, vector<1x384xf32> -> vector<1x384xf32>
    %c0_66 = arith.constant 0 : index
    %c0_67 = arith.constant 0 : index
    %226 = vector.load %arg6[%c0_66, %c0_67] : memref<1x384xf32, #tpu.memory_space<vmem>>, vector<1x384xf32>
    %227 = arith.addf %225, %226 : vector<1x384xf32>
    %228 = vector.extract_strided_slice %5 {offsets = [7, 0], sizes = [1, 384], strides = [1, 1]} : vector<8x384xf32> to vector<1x384xf32>
    %229 = vector.extract_strided_slice %228 {offsets = [0, 0], sizes = [1, 128], strides = [1, 1]} : vector<1x384xf32> to vector<1x128xf32>
    %230 = vector.extract_strided_slice %227 {offsets = [0, 0], sizes = [1, 128], strides = [1, 1]} : vector<1x384xf32> to vector<1x128xf32>
    %231 = arith.addf %229, %230 : vector<1x128xf32>
    %232 = arith.negf %231 : vector<1x128xf32>
    %233 = math.exp %232 : vector<1x128xf32>
    %cst_68 = arith.constant 1.000000e+00 : f32
    %234 = vector.broadcast %cst_68 : f32 to vector<1x128xf32>
    %235 = arith.addf %234, %233 : vector<1x128xf32>
    %236 = arith.divf %234, %235 : vector<1x128xf32>
    %237 = vector.extract_strided_slice %228 {offsets = [0, 128], sizes = [1, 128], strides = [1, 1]} : vector<1x384xf32> to vector<1x128xf32>
    %238 = vector.extract_strided_slice %227 {offsets = [0, 128], sizes = [1, 128], strides = [1, 1]} : vector<1x384xf32> to vector<1x128xf32>
    %239 = arith.addf %237, %238 : vector<1x128xf32>
    %240 = arith.negf %239 : vector<1x128xf32>
    %241 = math.exp %240 : vector<1x128xf32>
    %cst_69 = arith.constant 1.000000e+00 : f32
    %242 = vector.broadcast %cst_69 : f32 to vector<1x128xf32>
    %243 = arith.addf %242, %241 : vector<1x128xf32>
    %244 = arith.divf %242, %243 : vector<1x128xf32>
    %245 = vector.extract_strided_slice %228 {offsets = [0, 256], sizes = [1, 128], strides = [1, 1]} : vector<1x384xf32> to vector<1x128xf32>
    %246 = vector.extract_strided_slice %227 {offsets = [0, 256], sizes = [1, 128], strides = [1, 1]} : vector<1x384xf32> to vector<1x128xf32>
    %247 = arith.mulf %236, %246 : vector<1x128xf32>
    %248 = arith.addf %245, %247 : vector<1x128xf32>
    %249 = math.tanh %248 : vector<1x128xf32>
    %cst_70 = arith.constant 1.000000e+00 : f32
    %250 = vector.broadcast %cst_70 : f32 to vector<1x128xf32>
    %251 = arith.subf %250, %244 : vector<1x128xf32>
    %252 = arith.mulf %251, %249 : vector<1x128xf32>
    %253 = arith.mulf %244, %223 : vector<1x128xf32>
    %254 = arith.addf %252, %253 : vector<1x128xf32>
    %255 = tpu.concatenate %37, %68, %99, %130, %161, %192, %223, %254 in 0 : vector<1x128xf32>, vector<1x128xf32>, vector<1x128xf32>, vector<1x128xf32>, vector<1x128xf32>, vector<1x128xf32>, vector<1x128xf32>, vector<1x128xf32> -> vector<8x128xf32>
    %c0_71 = arith.constant 0 : index
    %c0_72 = arith.constant 0 : index
    %256 = vector.load %arg7[%c0_71, %c0_72] : memref<8x128xf32, #tpu.memory_space<vmem>>, vector<8x128xf32>
    tpu.vector_store %arg7[%c0_71, %c0_72], %255 {strides = array<i32>} : memref<8x128xf32, #tpu.memory_space<vmem>>, vector<8x128xf32>,
    return
  }
  func.func @transform_0(%arg0: i32) -> (i32, i32) {
    %c0_i32 = arith.constant 0 : i32
    %c0_i32_0 = arith.constant 0 : i32
    %c0_i32_1 = arith.constant 0 : i32
    return %c0_i32, %c0_i32_0 : i32, i32
  }
  func.func @transform_1(%arg0: i32) -> (i32, i32) {
    %c0_i32 = arith.constant 0 : i32
    %c0_i32_0 = arith.constant 0 : i32
    %c0_i32_1 = arith.constant 0 : i32
    return %c0_i32, %c0_i32_0 : i32, i32
  }
  func.func @transform_2(%arg0: i32) -> (i32, i32) {
    %c0_i32 = arith.constant 0 : i32
    %c0_i32_0 = arith.constant 0 : i32
    %c0_i32_1 = arith.constant 0 : i32
    return %c0_i32, %c0_i32_0 : i32, i32
  }
  func.func @transform_3(%arg0: i32) -> (i32, i32) {
    %c0_i32 = arith.constant 0 : i32
    %c0_i32_0 = arith.constant 0 : i32
    %c0_i32_1 = arith.constant 0 : i32
    return %c0_i32, %c0_i32_0 : i32, i32
  }
  func.func @transform_4(%arg0: i32) -> (i32, i32) {
    %c0_i32 = arith.constant 0 : i32
    %c0_i32_0 = arith.constant 0 : i32
    %c0_i32_1 = arith.constant 0 : i32
    return %c0_i32, %c0_i32_0 : i32, i32
  }
  func.func @transform_5(%arg0: i32) -> (i32, i32) {
    %c0_i32 = arith.constant 0 : i32
    %c0_i32_0 = arith.constant 0 : i32
    %c0_i32_1 = arith.constant 0 : i32
    return %c0_i32, %c0_i32_0 : i32, i32
  }
  func.func @transform_6(%arg0: i32) -> (i32, i32) {
    %c0_i32 = arith.constant 0 : i32
    %c0_i32_0 = arith.constant 0 : i32
    %c0_i32_1 = arith.constant 0 : i32
    return %c0_i32, %c0_i32_0 : i32, i32
  }
}

</mosaic_0001>

<bundles_post_ra>
// kernel: tpu_custom_call.1
= control target key start
LH: loop header
LB: loop body
LE: loop exit
PB: predicated region body
PF: predicated region fallthrough
CT: control target
= control target key end

     0   :  { %11 = vsyncpa [#allocation3], 0  ;;  %s3308_s0 = inlined_call_operand.hbm [shape: f32[8,32], index: 0, kind: input, shape index: {}]   ;;  %s3309_s1 = inlined_call_operand.vmem [shape: f32[1,128], index: 1, kind: input, shape index: {}]   ;;  %s3310_s2 = inlined_call_operand.hbm [shape: f32[32,384], index: 2, kind: input, shape index: {}]   ;;  %s3311_s3 = inlined_call_operand.vmem [shape: f32[1,384], index: 3, kind: input, shape index: {}]   ;;  %s3312_s4 = inlined_call_operand.hbm [shape: f32[128,384], index: 4, kind: input, shape index: {}]   ;;  %s3313_s5 = inlined_call_operand.vmem [shape: f32[1,384], index: 5, kind: input, shape index: {}]   ;;  %s3314_s6 = inlined_call_operand.hbm [shape: f32[8,128], index: 6, kind: output, shape index: {}]  }
   0x1   :  { %12 = vsyncpa [#allocation6], 0 }
   0x2   :  { %13 = vsyncpa [#allocation4], 0  ;;  %s2399_s21 = smov [#allocation5]  }
   0x3   :  { %s31_s22 = sshll.u32 %s2399_s21, 4  ;;  %s32_s22 = int_to_ptr.vmem [resolvable:$true] %s31_s22 }
   0x4   :  { %s2321_s23 = scalar_lea.vmem %s32_s22, 1536  ;;  %p2326_p1 = scmp.lt.s32.totalorder %s32_s22, %s32_s22 }
   0x5   :  { %p2322_p0 = scmp.ne.s32.totalorder %s32_s22, %s2321_s23  ;;  %p2327_p2 = scmp.lt.s32.totalorder %s2321_s23, %s2321_s23 }
   0x7   :  { %p2328_p3 = por %p2327_p2, %p2326_p1 }
   0x9   :  { %p2329_p4 = pnand %p2328_p3, %p2322_p0 }
   0xb   :  { %2332 = shalt.err (!%p2329_p4)
}
   0xc   :  { %s2400_s24 = smov 384   ;;  %s2401_s25 = smov 24  }
   0xd   :  { %37 = dma.hbm_to_vmem [thread:$0]  %s3310_s2, 1536, %s32_s22, [#allocation6], %s2400_s24, %s2400_s24, %s2401_s25  }
   0xe   :  { %s2402_s28 = smov [#allocation2]   ;;  %s2403_s30 = smov [#allocation7]  }
   0xf   :  { %s20_s29 = sshll.u32 %s2402_s28, 4  ;;  %s45_s7 = sshll.u32 %s2403_s30, 4  ;;  %s21_s29 = int_to_ptr.vmem [resolvable:$true] %s20_s29  ;;  %s46_s7 = int_to_ptr.vmem [resolvable:$true] %s45_s7 }
  0x10   :  { %s2341_s8 = scalar_lea.vmem %s21_s29, 128  ;;  %p2346_p6 = scmp.lt.s32.totalorder %s21_s29, %s21_s29 }
  0x11   :  { %p2342_p5 = scmp.ne.s32.totalorder %s21_s29, %s2341_s8  ;;  %p2347_p7 = scmp.lt.s32.totalorder %s2341_s8, %s2341_s8 }
  0x13   :  { %p2348_p8 = por %p2347_p7, %p2346_p6 }
  0x15   :  { %p2349_p9 = pnand %p2348_p8, %p2342_p5 }
  0x17   :  { %2352 = shalt.err (!%p2349_p9)
}
  0x18   :  { %23 = dma.hbm_to_vmem [thread:$0]  %s3308_s0, 128, %s21_s29, [#allocation3]  }
  0x19   :  { %s2361_s11 = scalar_lea.vmem %s46_s7, 6144  ;;  %p2366_p11 = scmp.lt.s32.totalorder %s46_s7, %s46_s7 }
  0x1a   :  { %p2362_p10 = scmp.ne.s32.totalorder %s46_s7, %s2361_s11  ;;  %p2367_p12 = scmp.lt.s32.totalorder %s2361_s11, %s2361_s11 }
  0x1c   :  { %p2368_p13 = por %p2367_p12, %p2366_p11 }
  0x1e   :  { %p2369_p0 = pnand %p2368_p13, %p2362_p10 }
  0x20   :  { %2372 = shalt.err (!%p2369_p0)
}
  0x21   :  { %51 = dma.hbm_to_vmem [thread:$0]  %s3312_s4, 6144, %s46_s7, [#allocation6], %s2400_s24, %s2400_s24, %s2401_s25  }
  0x22   :  { %2393 = dma.done.wait [#allocation3], 128  }
  0x23   :  { %2394 = vsyncadd [#allocation3], 4294967168 }
  0x24   :  { %2395 = dma.done.wait [#allocation6], 7680  }
  0x25   :  { %2396 = vsyncadd [#allocation6], 4294959616  ;;  %v3315_v0 = vmov 0.0   ;;  %vm2405_vm0 = vmmov 0   ;;  %v74_v1 = vld [vmem:[#allocation5 + $0x50] sm:$0xff]  ;;  %v73_v2 = vld [vmem:[#allocation5 + $0x48] sm:$0xff] }
  0x26   :  { %161 = vmatprep.mubr.f32.mxu0 %v3315_v0  ;;  %1886 = vmatprep.subr.mxu1 %v3315_v0  ;;  %v71_v3 = vld [vmem:[#allocation5 + $0x38] sm:$0xff]  ;;  %v70_v4 = vld [vmem:[#allocation5 + $0x30] sm:$0xff]  ;;  %v68_v5 = vld [vmem:[#allocation5 + $0x20] sm:$0xff]  ;;  %vm93_vm1 = vcmask 261120   ;;  %vm1696_vm2 = vcmask 1040384   ;;  %vm1698_vm3 = vcmask 1041408  }
  0x27   :  { %1894 = vmatprep.mubr.msk.f32.mxu1 %vm2405_vm0, %v3315_v0  ;;  %121 = vmatprep.subr.mxu0 %v74_v1  ;;  %v67_v6 = vld [vmem:[#allocation5 + $0x18] sm:$0xff]  ;;  %v65_v7 = vld [vmem:[#allocation5 + $0x8] sm:$0xff]  ;;  %v64_v8 = vld [vmem:[#allocation5] sm:$0xff]  ;;  %vm1700_vm4 = vcmask 1042432   ;;  %vm1702_vm5 = vcmask 1043456   ;;  %vm1704_vm6 = vcmask 1044480  }
  0x28   :  { %122 = vmatpush1.msra.mxu0 %v73_v2  ;;  %v63_v9 = vld [vmem:[#allocation2] sm:$0xff]  ;;  %v2455_v10 = vld [vmem:[#allocation7 + $0x170] sm:$0xff]  ;;  %v2457_v11 = vld [vmem:[#allocation7 + $0x168] sm:$0xff]  ;;  %v78_v2 = vlaneseq  ;;  %vm1706_vm7 = vcmask 1045504   ;;  %vm1708_vm8 = vcmask 1046528  }
  0x29   :  { %123 = vmatprep.subr.mxu0 %v71_v3  ;;  %3345 = vst [vmem:[#allocation12_spill] sm:$0xff] %v2455_v10  ;;  %v2459_v12 = vld [vmem:[#allocation7 + $0x158] sm:$0xff]  ;;  %v2463_v13 = vld [vmem:[#allocation7 + $0x150] sm:$0xff]  ;;  %v2466_v14 = vld [vmem:[#allocation7 + $0x140] sm:$0xff] }
  0x2a   :  { %124 = vmatpush1.msra.mxu0 %v70_v4  ;;  %v2470_v15 = vld [vmem:[#allocation7 + $0x138] sm:$0xff]  ;;  %v2473_v17 = vld [vmem:[#allocation7 + $0x128] sm:$0xff]  ;;  %v72_v18 = vld [vmem:[#allocation5 + $0x40] sm:$0xff]  ;;  %v79_v3 = vshrl.u32 %v78_v2, 7 }
  0x2b   :  { %125 = vmatprep.subr.mxu0 %v68_v5  ;;  %v75_v16 = vld [vmem:[#allocation5 + $0x58] sm:$0xff]  ;;  %v2476_v19 = vld [vmem:[#allocation7 + $0x120] sm:$0xff]  ;;  %v69_v20 = vld [vmem:[#allocation5 + $0x28] sm:$0xff] }
  0x2c   :  { %126 = vmatpush1.msra.mxu0 %v67_v6  ;;  %1887 = vmatpush3.msra.mxu1 %v75_v16  ;;  %v2480_v21 = vld [vmem:[#allocation7 + $0x110] sm:$0xff]  ;;  %v2483_v22 = vld [vmem:[#allocation7 + $0x108] sm:$0xff]  ;;  %v2487_v24 = vld [vmem:[#allocation7 + $0xf8] sm:$0xff]  ;;  %v80_v4 = vsub.s32 0, %v79_v3 }
  0x2d   :  { %127 = vmatprep.subr.mxu0 %v65_v7  ;;  %1888 = vmatprep.subr.mxu1 %v3315_v0  ;;  %v66_v23 = vld [vmem:[#allocation5 + $0x10] sm:$0xff]  ;;  %v2494_v26 = vld [vmem:[#allocation7 + $0xe0] sm:$0xff]  ;;  %v2496_v27 = vld [vmem:[#allocation7 + $0x178] sm:$0xff] }
  0x2e   :  { %128 = vmatpush1.msra.mxu0 %v64_v8  ;;  %1889 = vmatpush3.msra.mxu1 %v72_v18  ;;  %v2490_v25 = vld [vmem:[#allocation7 + $0xf0] sm:$0xff]  ;;  %v2499_v28 = vld [vmem:[#allocation7 + $0xd8] sm:$0xff]  ;;  %v2503_v29 = vld [vmem:[#allocation7 + $0xc8] sm:$0xff]  ;;  %v84_v18 = vsub.s32 1, %v79_v3 }
  0x2f   :  { %1727 = vmatmul.mubr.msk.f32.vlgmr.msra.gmra.mxu0 %vm93_vm1, %v63_v9  ;;  %304 = vmatprep.subr.mxu0 %v2455_v10  ;;  %v2506_v30 = vld [vmem:[#allocation7 + $0x160] sm:$0xff]  ;;  %v2513_v32 = vld [vmem:[#allocation7 + $0xb0] sm:$0xff]  ;;  %v2516_v33 = vld [vmem:[#allocation7 + $0x148] sm:$0xff] }
  0x30   :  { %305 = vmatpush1.msra.mxu0 %v2457_v11  ;;  %368 = vmatprep.mubr.f32.mxu0 %v3315_v0  ;;  %v2509_v31 = vld [vmem:[#allocation7 + $0xc0] sm:$0xff]  ;;  %v2519_v34 = vld [vmem:[#allocation7 + $0xa8] sm:$0xff]  ;;  %v2523_v35 = vld [vmem:[#allocation7 + $0x98] sm:$0xff] }
  0x31   :  { %306 = vmatprep.subr.mxu0 %v2459_v12  ;;  %1890 = vmatprep.subr.mxu1 %v3315_v0  ;;  %v2526_v36 = vld [vmem:[#allocation7 + $0x130] sm:$0xff]  ;;  %v2533_v38 = vld [vmem:[#allocation7 + $0x80] sm:$0xff]  ;;  %v2536_v39 = vld [vmem:[#allocation7 + $0x118] sm:$0xff] }
  0x32   :  { %307 = vmatpush1.msra.mxu0 %v2463_v13  ;;  %1891 = vmatpush3.msra.mxu1 %v69_v20  ;;  %v2529_v37 = vld [vmem:[#allocation7 + $0x90] sm:$0xff]  ;;  %v2539_v40 = vld [vmem:[#allocation7 + $0x78] sm:$0xff]  ;;  %v2543_v41 = vld [vmem:[#allocation7 + $0x68] sm:$0xff] }
  0x33   :  { %308 = vmatprep.subr.mxu0 %v2466_v14  ;;  %1892 = vmatprep.subr.mxu1 %v3315_v0  ;;  %v2546_v42 = vld [vmem:[#allocation7 + $0x100] sm:$0xff]  ;;  %v2553_v44 = vld [vmem:[#allocation7 + $0x50] sm:$0xff]  ;;  %v2556_v45 = vld [vmem:[#allocation7 + $0xe8] sm:$0xff] }
  0x34   :  { %309 = vmatpush1.msra.mxu0 %v2470_v15  ;;  %1893 = vmatpush3.msra.mxu1 %v66_v23  ;;  %v2549_v43 = vld [vmem:[#allocation7 + $0x60] sm:$0xff]  ;;  %v2559_v46 = vld [vmem:[#allocation7 + $0x48] sm:$0xff]  ;;  %v2563_v47 = vld [vmem:[#allocation7 + $0x38] sm:$0xff] }
  0x35   :  { %310 = vmatprep.subr.mxu0 %v2473_v17  ;;  %1897 = vmatprep.subr.mxu1 %v3315_v0  ;;  %v2566_v48 = vld [vmem:[#allocation7 + $0xd0] sm:$0xff]  ;;  %v2573_v50 = vld [vmem:[#allocation7 + $0x20] sm:$0xff]  ;;  %v2576_v51 = vld [vmem:[#allocation7 + $0xb8] sm:$0xff] }
  0x36   :  { %311 = vmatpush1.msra.mxu0 %v2476_v19  ;;  %1895 = vmatmul.mubr.msk.f32.vlgmr.msra.gmra.mxu1 %vm93_vm1, %v63_v9  ;;  %v2569_v49 = vld [vmem:[#allocation7 + $0x30] sm:$0xff]  ;;  %3347 = vst [vmem:[#allocation14_spill] sm:$0xff] %v2573_v50  ;;  %v2579_v52 = vld [vmem:[#allocation7 + $0x18] sm:$0xff]  ;;  %v2583_v53 = vld [vmem:[#allocation7 + $0x8] sm:$0xff] }
  0x37   :  { %312 = vmatprep.subr.mxu0 %v2480_v21  ;;  %1898 = vmatpush3.msra.mxu1 %v2496_v27  ;;  %3346 = vst [vmem:[#allocation13_spill] sm:$0xff] %v2569_v49  ;;  %3348 = vst [vmem:[#allocation15_spill] sm:$0xff] %v2579_v52  ;;  %v2586_v54 = vld [vmem:[#allocation7 + $0xa0] sm:$0xff]  ;;  %v2596_v56 = vld [vmem:[%s3309_s1] sm:$0x1] }
  0x38   :  { %313 = vmatpush1.msra.mxu0 %v2483_v22  ;;  %1899 = vmatprep.subr.mxu1 %v3315_v0  ;;  %3349 = vst [vmem:[#allocation16_spill] sm:$0xff] %v2583_v53  ;;  %v2589_v55 = vld [vmem:[#allocation7] sm:$0xff]  ;;  %v2599_v57 = vld [vmem:[#allocation7 + $0x88] sm:$0xff]  ;;  %v2605_v58 = vld [vmem:[#allocation7 + $0x70] sm:$0xff] }
  0x39   :  { %314 = vmatprep.subr.mxu0 %v2487_v24  ;;  %1900 = vmatpush3.msra.mxu1 %v2506_v30  ;;  %3350 = vst [vmem:[#allocation17_spill] sm:$0xff] %v2589_v55  ;;  %v2610_v59 = vld [vmem:[#allocation7 + $0x58] sm:$0xff]  ;;  %v2617_v60 = vld [vmem:[#allocation7 + $0x40] sm:$0xff]  ;;  %v2623_v61 = vld [vmem:[#allocation7 + $0x28] sm:$0xff] }
  0x3a   :  { %315 = vmatpush1.msra.mxu0 %v2490_v25  ;;  %1901 = vmatprep.subr.mxu1 %v3315_v0  ;;  %3351 = vst [vmem:[#allocation18_spill] sm:$0xff] %v2617_v60  ;;  %3352 = vst [vmem:[#allocation19_spill] sm:$0xff] %v2623_v61  ;;  %v2629_v62 = vld [vmem:[#allocation7 + $0x10] sm:$0xff]  ;;  %v76_v5 = vld [vmem:[%s3311_s3] sm:$0x7]  ;;  %s2406_s3 = smov [#allocation8]  }
  0x3b   :  { %316 = vmatprep.subr.mxu0 %v2494_v26  ;;  %1902 = vmatpush3.msra.mxu1 %v2516_v33  ;;  %3353 = vst [vmem:[#allocation20_spill] sm:$0xff] %v2629_v62  ;;  %v287_v7 = vld [vmem:[%s3313_s5] sm:$0x7]  ;;  %v81_v8 = vrot.slane %v76_v5, %v80_v4  ;;  %s1717_s5 = sshll.u32 %s2406_s3, 4  ;;  %s1718_s5 = int_to_ptr.vmem [resolvable:$true] %s1717_s5 }
  0x3c   :  { %317 = vmatpush1.msra.mxu0 %v2499_v28  ;;  %1903 = vmatprep.subr.mxu1 %v3315_v0  ;;  %v2705_v9 = vrot.slane %v287_v7, %v80_v4  ;;  %s2373_s16 = scalar_lea.vmem %s1718_s5, 128  ;;  %p2378_p2 = scmp.lt.s32.totalorder %s1718_s5, %s1718_s5 }
  0x3d   :  { %318 = vmatprep.subr.mxu0 %v2503_v29  ;;  %1904 = vmatpush3.msra.mxu1 %v2526_v36  ;;  %p2374_p1 = scmp.ne.s32.totalorder %s1718_s5, %s2373_s16  ;;  %p2379_p3 = scmp.lt.s32.totalorder %s2373_s16, %s2373_s16 }
  0x3e   :  { %319 = vmatpush1.msra.mxu0 %v2509_v31  ;;  %1905 = vmatprep.subr.mxu1 %v3315_v0  ;;  %3354 = vst [vmem:[#allocation21_spill] sm:$0xff] %v2705_v9 }
  0x3f   :  { %320 = vmatprep.subr.mxu0 %v2513_v32  ;;  %1906 = vmatpush3.msra.mxu1 %v2536_v39  ;;  %p2380_p4 = por %p2379_p3, %p2378_p2 }
  0x40   :  { %321 = vmatpush1.msra.mxu0 %v2519_v34  ;;  %1907 = vmatprep.subr.mxu1 %v3315_v0 }
  0x41   :  { %322 = vmatprep.subr.mxu0 %v2523_v35  ;;  %1908 = vmatpush3.msra.mxu1 %v2546_v42  ;;  %p2381_p5 = pnand %p2380_p4, %p2374_p1 }
  0x42   :  { %323 = vmatpush1.msra.mxu0 %v2529_v37  ;;  %1909 = vmatprep.subr.mxu1 %v3315_v0 }
  0x43   :  { %324 = vmatprep.subr.mxu0 %v2533_v38  ;;  %1910 = vmatpush3.msra.mxu1 %v2556_v45 }
  0x44   :  { %325 = vmatpush1.msra.mxu0 %v2539_v40  ;;  %1911 = vmatprep.subr.mxu1 %v3315_v0 }
  0x45   :  { %326 = vmatprep.subr.mxu0 %v2543_v41  ;;  %1912 = vmatpush3.msra.mxu1 %v2566_v48 }
  0x46   :  { %327 = vmatpush1.msra.mxu0 %v2549_v43  ;;  %1913 = vmatprep.subr.mxu1 %v3315_v0 }
  0x47   :  { %328 = vmatprep.subr.mxu0 %v2553_v44  ;;  %1914 = vmatpush3.msra.mxu1 %v2576_v51 }
  0x48   :  { %329 = vmatpush1.msra.mxu0 %v2559_v46  ;;  %1915 = vmatprep.subr.mxu1 %v3315_v0 }
  0x49   :  { %330 = vmatprep.subr.mxu0 %v2563_v47  ;;  %1916 = vmatpush3.msra.mxu1 %v2586_v54 }
  0x4a   :  { %331 = vmatpush1.msra.mxu0 %v2569_v49  ;;  %1917 = vmatprep.subr.mxu1 %v3315_v0 }
  0x4b   :  { %332 = vmatprep.subr.mxu0 %v2573_v50  ;;  %1918 = vmatpush3.msra.mxu1 %v2599_v57 }
  0x4c   :  { %333 = vmatpush1.msra.mxu0 %v2579_v52  ;;  %1919 = vmatprep.subr.mxu1 %v3315_v0 }
  0x4d   :  { %334 = vmatprep.subr.mxu0 %v2583_v53  ;;  %1929 = vmatprep.mubr.msk.f32.mxu1 %vm2405_vm0, %v3315_v0 }
  0x4e   :  { %335 = vmatpush1.msra.mxu0 %v2589_v55  ;;  %1920 = vmatpush3.msra.mxu1 %v2605_v58 }
  0x4f   :  { %369 = vmatmul.mubr.f32.vlgmr.msra.gmra.mxu0 %v2596_v56  ;;  %466 = vmatprep.subr.mxu0 %v2455_v10 }
  0x50   :  { %1921 = vmatprep.subr.mxu1 %v3315_v0  ;;  %467 = vmatpush1.msra.mxu0 %v2457_v11 }
  0x51   :  { %1922 = vmatpush3.msra.mxu1 %v2610_v59  ;;  %468 = vmatprep.subr.mxu0 %v2459_v12 }
  0x52   :  { %1923 = vmatprep.subr.mxu1 %v3315_v0  ;;  %469 = vmatpush1.msra.mxu0 %v2463_v13 }
  0x53   :  { %1924 = vmatpush3.msra.mxu1 %v2617_v60  ;;  %470 = vmatprep.subr.mxu0 %v2466_v14 }
  0x54   :  { %1925 = vmatprep.subr.mxu1 %v3315_v0  ;;  %471 = vmatpush1.msra.mxu0 %v2470_v15 }
  0x55   :  { %1926 = vmatpush3.msra.mxu1 %v2623_v61  ;;  %472 = vmatprep.subr.mxu0 %v2473_v17 }
  0x56   :  { %1927 = vmatprep.subr.mxu1 %v3315_v0  ;;  %473 = vmatpush1.msra.mxu0 %v2476_v19 }
  0x57   :  { %1928 = vmatpush3.msra.mxu1 %v2629_v62  ;;  %474 = vmatprep.subr.mxu0 %v2480_v21 }
  0x58   :  { %1930 = vmatmul.mubr.f32.vlgmr.msra.gmra.mxu1 %v2596_v56  ;;  %1932 = vmatprep.subr.mxu1 %v3315_v0 }
  0x59   :  { %1933 = vmatpush3.msra.mxu1 %v2496_v27  ;;  %475 = vmatpush1.msra.mxu0 %v2483_v22 }
  0x5a   :  { %1934 = vmatprep.subr.mxu1 %v3315_v0  ;;  %476 = vmatprep.subr.mxu0 %v2487_v24 }
  0x5b   :  { %1935 = vmatpush3.msra.mxu1 %v2506_v30  ;;  %477 = vmatpush1.msra.mxu0 %v2490_v25 }
  0x5c   :  { %1936 = vmatprep.subr.mxu1 %v3315_v0  ;;  %478 = vmatprep.subr.mxu0 %v2494_v26 }
  0x5d   :  { %1937 = vmatpush3.msra.mxu1 %v2516_v33  ;;  %479 = vmatpush1.msra.mxu0 %v2499_v28 }
  0x5e   :  { %1938 = vmatprep.subr.mxu1 %v3315_v0  ;;  %480 = vmatprep.subr.mxu0 %v2503_v29 }
  0x5f   :  { %1939 = vmatpush3.msra.mxu1 %v2526_v36  ;;  %481 = vmatpush1.msra.mxu0 %v2509_v31 }
  0x60   :  { %1940 = vmatprep.subr.mxu1 %v3315_v0  ;;  %482 = vmatprep.subr.mxu0 %v2513_v32 }
  0x61   :  { %1941 = vmatpush3.msra.mxu1 %v2536_v39  ;;  %483 = vmatpush1.msra.mxu0 %v2519_v34 }
  0x62   :  { %1942 = vmatprep.subr.mxu1 %v3315_v0  ;;  %484 = vmatprep.subr.mxu0 %v2523_v35 }
  0x63   :  { %1943 = vmatpush3.msra.mxu1 %v2546_v42  ;;  %485 = vmatpush1.msra.mxu0 %v2529_v37 }
  0x64   :  { %1944 = vmatprep.subr.mxu1 %v3315_v0  ;;  %486 = vmatprep.subr.mxu0 %v2533_v38 }
  0x65   :  { %1945 = vmatpush3.msra.mxu1 %v2556_v45  ;;  %487 = vmatpush1.msra.mxu0 %v2539_v40 }
  0x66   :  { %1946 = vmatprep.subr.mxu1 %v3315_v0  ;;  %488 = vmatprep.subr.mxu0 %v2543_v41 }
  0x67   :  { %1947 = vmatpush3.msra.mxu1 %v2566_v48  ;;  %489 = vmatpush1.msra.mxu0 %v2549_v43 }
  0x68   :  { %1948 = vmatprep.subr.mxu1 %v3315_v0  ;;  %490 = vmatprep.subr.mxu0 %v2553_v44 }
  0x69   :  { %1949 = vmatpush3.msra.mxu1 %v2576_v51  ;;  %491 = vmatpush1.msra.mxu0 %v2559_v46 }
  0x6a   :  { %1950 = vmatprep.subr.mxu1 %v3315_v0  ;;  %492 = vmatprep.subr.mxu0 %v2563_v47 }
  0x6b   :  { %1951 = vmatpush3.msra.mxu1 %v2586_v54  ;;  %493 = vmatpush1.msra.mxu0 %v2569_v49 }
  0x6c   :  { %1952 = vmatprep.subr.mxu1 %v3315_v0  ;;  %494 = vmatprep.subr.mxu0 %v2573_v50 }
  0x6d   :  { %1953 = vmatpush3.msra.mxu1 %v2599_v57  ;;  %495 = vmatpush1.msra.mxu0 %v2579_v52 }
  0x6e   :  { %1954 = vmatprep.subr.mxu1 %v3315_v0  ;;  %496 = vmatprep.subr.mxu0 %v2583_v53 }
  0x6f   :  { %1955 = vmatpush3.msra.mxu1 %v2605_v58  ;;  %497 = vmatpush1.msra.mxu0 %v2589_v55 }
  0x70   :  { %1956 = vmatprep.subr.mxu1 %v3315_v0  ;;  %530 = vmatprep.mubr.f32.mxu0 %v3315_v0 }
  0x71   :  { %1957 = vmatpush3.msra.mxu1 %v2610_v59  ;;  %1964 = vmatprep.mubr.msk.f32.mxu1 %vm2405_vm0, %v3315_v0 }
  0x72   :  { %1958 = vmatprep.subr.mxu1 %v3315_v0  ;;  %643 = vmatprep.subr.mxu0 %v2455_v10  ;;  %v85_v10 = vrot.slane %v76_v5, %v84_v18 }
  0x73   :  { %1959 = vmatpush3.msra.mxu1 %v2617_v60 }
  0x74   :  { %1960 = vmatprep.subr.mxu1 %v3315_v0 }
  0x75   :  { %1961 = vmatpush3.msra.mxu1 %v2623_v61 }
  0x76   :  { %1962 = vmatprep.subr.mxu1 %v3315_v0 }
  0x77   :  { %1963 = vmatpush3.msra.mxu1 %v2629_v62 }
  0x78   :  { %1967 = vmatprep.subr.mxu1 %v3315_v0 }
  0xef   :  { %v163_v6 = vpop.f32.mrf.mxu0 }
  0xf0   :  { %v2707_v23 = vadd.f32 %v163_v6, %v81_v8 }
  0xf1   :  { %v165_v16 = vpop.f32.mrf.mxu0 }
  0xf2   :  { %v2714_v61 = vadd.f32 %v165_v16, %v85_v10 }
  0xf6   :  { %v234_v63 = vpop.f32.mrf.mxu1 }
  0xf8   :  { %v1896_v1 = vpop.f32.mrf.mxu1 }
  0xf9   :  { %v2709_v1 = vrot.slane %v287_v7, %v84_v18 }
 0x10f   :  { %v370_v20 = vpop.f32.mrf.mxu0 }
 0x110   :  { %v371_v2 = vadd.f32 %v370_v20, %v2705_v9  ;;  %v88_v20 = vsub.s32 2, %v79_v3 }
 0x111   :  { %v372_v0 = vpop.f32.mrf.mxu0 }
 0x112   :  { %v445_v62 = vadd.f32 %v371_v2, %v2707_v23  ;;  %v373_v53 = vadd.f32 %v372_v0, %v2709_v1  ;;  %v2717_v9 = vrot.slane %v287_v7, %v88_v20  ;;  %v89_v2 = vrot.slane %v76_v5, %v88_v20  ;;  %v3358_v5 = vld [vmem:[#allocation15_spill] sm:$0xff]  ;;  %v3360_v20 = vld [vmem:[#allocation16_spill] sm:$0xff] }
 0x114   :  { %v1729_v55 = vmul.f32 -1.442695, %v445_v62  ;;  %v452_v4 = vadd.f32 %v373_v53, %v2714_v61  ;;  %v2720_v16 = vadd.f32 %v234_v63, %v89_v2  ;;  %v3357_v63 = vld [vmem:[#allocation14_spill] sm:$0xff]  ;;  %v3362_v2 = vld [vmem:[#allocation20_spill] sm:$0xff] }
 0x116   :  { %2185 = vpow2.f32 %v1729_v55  ;;  %v1730_v50 = vmul.f32 -1.442695, %v452_v4 }
 0x118   :  { %v441_v52 = vpop.f32.mrf.mxu1  ;;  %2187 = vpow2.f32 %v1730_v50 }
 0x119   :  { %v442_v0 = vadd.f32 %v441_v52, %v2717_v9  ;;  %v3355_v52 = vmov 0.0  }
 0x11a   :  { %v1931_v6 = vpop.f32.mrf.mxu1 }
 0x123   :  { %v2186_v8 = vpop.eup %2185 }
 0x124   :  { %v449_v60 = vadd.f32 1.0, %v2186_v8  ;;  %v3359_v8 = vld [vmem:[#allocation19_spill] sm:$0xff] }
 0x125   :  { %v2188_v18 = vpop.eup %2187 }
 0x126   :  { %2189 = vrcp.f32 %v449_v60  ;;  %v456_v62 = vadd.f32 1.0, %v2188_v18  ;;  %v3361_v18 = vld [vmem:[#allocation17_spill] sm:$0xff] }
 0x128   :  { %2191 = vrcp.f32 %v456_v62  ;;  %v3363_v62 = vld [vmem:[#allocation12_spill] sm:$0xff] }
 0x133   :  { %v2190_v10 = vpop.eup %2189 }
 0x134   :  { %v459_v53 = vmul.f32 %v2190_v10, %v442_v0 }
 0x135   :  { %v2192_v50 = vpop.eup %2191 }
 0x136   :  { %v460_v55 = vadd.f32 %v459_v53, %v2720_v16  ;;  %v462_v4 = vsub.f32 1.0, %v2192_v50  ;;  %v464_v3 = vmul.f32 %v2192_v50, %v2596_v56  ;;  %v3356_v56 = vld [vmem:[#allocation18_spill] sm:$0xff]  ;;  %v3364_v53 = vld [vmem:[#allocation21_spill] sm:$0xff] }
 0x138   :  { %2193 = vtanh.f32 %v460_v55 }
 0x145   :  { %v2194_v6 = vpop.eup %2193 }
 0x146   :  { %v463_v60 = vmul.f32 %v2194_v6, %v462_v4 }
 0x148   :  { %v2724_v7 = vadd.f32 %v464_v3, %v463_v60 }
 0x14a   :  { %531 = vmatmul.mubr.f32.vlgmr.msra.gmra.mxu0 %v2724_v7  ;;  %1965 = vmatmul.mubr.f32.vlgmr.msra.gmra.mxu1 %v2724_v7 }
 0x14b   :  { %644 = vmatpush1.msra.mxu0 %v2457_v11  ;;  %1968 = vmatpush3.msra.mxu1 %v2496_v27 }
 0x14c   :  { %645 = vmatprep.subr.mxu0 %v2459_v12  ;;  %1969 = vmatprep.subr.mxu1 %v3355_v52 }
 0x14d   :  { %646 = vmatpush1.msra.mxu0 %v2463_v13  ;;  %1970 = vmatpush3.msra.mxu1 %v2506_v30 }
 0x14e   :  { %647 = vmatprep.subr.mxu0 %v2466_v14  ;;  %1971 = vmatprep.subr.mxu1 %v3355_v52 }
 0x14f   :  { %648 = vmatpush1.msra.mxu0 %v2470_v15  ;;  %1972 = vmatpush3.msra.mxu1 %v2516_v33 }
 0x150   :  { %649 = vmatprep.subr.mxu0 %v2473_v17  ;;  %1973 = vmatprep.subr.mxu1 %v3355_v52 }
 0x151   :  { %650 = vmatpush1.msra.mxu0 %v2476_v19  ;;  %1974 = vmatpush3.msra.mxu1 %v2526_v36 }
 0x152   :  { %651 = vmatprep.subr.mxu0 %v2480_v21  ;;  %1975 = vmatprep.subr.mxu1 %v3355_v52 }
 0x153   :  { %652 = vmatpush1.msra.mxu0 %v2483_v22  ;;  %1976 = vmatpush3.msra.mxu1 %v2536_v39 }
 0x154   :  { %653 = vmatprep.subr.mxu0 %v2487_v24  ;;  %1977 = vmatprep.subr.mxu1 %v3355_v52 }
 0x155   :  { %654 = vmatpush1.msra.mxu0 %v2490_v25  ;;  %1978 = vmatpush3.msra.mxu1 %v2546_v42 }
 0x156   :  { %655 = vmatprep.subr.mxu0 %v2494_v26  ;;  %1979 = vmatprep.subr.mxu1 %v3355_v52 }
 0x157   :  { %656 = vmatpush1.msra.mxu0 %v2499_v28  ;;  %1980 = vmatpush3.msra.mxu1 %v2556_v45 }
 0x158   :  { %657 = vmatprep.subr.mxu0 %v2503_v29  ;;  %1981 = vmatprep.subr.mxu1 %v3355_v52 }
 0x159   :  { %658 = vmatpush1.msra.mxu0 %v2509_v31  ;;  %1982 = vmatpush3.msra.mxu1 %v2566_v48 }
 0x15a   :  { %659 = vmatprep.subr.mxu0 %v2513_v32  ;;  %1983 = vmatprep.subr.mxu1 %v3355_v52 }
 0x15b   :  { %660 = vmatpush1.msra.mxu0 %v2519_v34  ;;  %1984 = vmatpush3.msra.mxu1 %v2576_v51 }
 0x15c   :  { %661 = vmatprep.subr.mxu0 %v2523_v35  ;;  %1985 = vmatprep.subr.mxu1 %v3355_v52 }
 0x15d   :  { %662 = vmatpush1.msra.mxu0 %v2529_v37  ;;  %1986 = vmatpush3.msra.mxu1 %v2586_v54 }
 0x15e   :  { %663 = vmatprep.subr.mxu0 %v2533_v38  ;;  %1987 = vmatprep.subr.mxu1 %v3355_v52 }
 0x15f   :  { %664 = vmatpush1.msra.mxu0 %v2539_v40  ;;  %1988 = vmatpush3.msra.mxu1 %v2599_v57 }
 0x160   :  { %665 = vmatprep.subr.mxu0 %v2543_v41  ;;  %1989 = vmatprep.subr.mxu1 %v3355_v52 }
 0x161   :  { %666 = vmatpush1.msra.mxu0 %v2549_v43  ;;  %1990 = vmatpush3.msra.mxu1 %v2605_v58 }
 0x162   :  { %667 = vmatprep.subr.mxu0 %v2553_v44  ;;  %1991 = vmatprep.subr.mxu1 %v3355_v52 }
 0x163   :  { %668 = vmatpush1.msra.mxu0 %v2559_v46  ;;  %1992 = vmatpush3.msra.mxu1 %v2610_v59 }
 0x164   :  { %669 = vmatprep.subr.mxu0 %v2563_v47  ;;  %1993 = vmatprep.subr.mxu1 %v3355_v52 }
 0x165   :  { %670 = vmatpush1.msra.mxu0 %v2569_v49  ;;  %1994 = vmatpush3.msra.mxu1 %v3356_v56 }
 0x166   :  { %671 = vmatprep.subr.mxu0 %v3357_v63  ;;  %1995 = vmatprep.subr.mxu1 %v3355_v52 }
 0x167   :  { %672 = vmatpush1.msra.mxu0 %v3358_v5  ;;  %1996 = vmatpush3.msra.mxu1 %v3359_v8 }
 0x168   :  { %673 = vmatprep.subr.mxu0 %v3360_v20  ;;  %1997 = vmatprep.subr.mxu1 %v3355_v52 }
 0x169   :  { %674 = vmatpush1.msra.mxu0 %v3361_v18  ;;  %707 = vmatprep.mubr.f32.mxu0 %v3355_v52 }
 0x16a   :  { %1998 = vmatpush3.msra.mxu1 %v3362_v2  ;;  %1999 = vmatprep.mubr.msk.f32.mxu1 %vm2405_vm0, %v3355_v52 }
 0x16b   :  { %819 = vmatprep.subr.mxu0 %v3363_v62  ;;  %2002 = vmatprep.subr.mxu1 %v3355_v52 }
 0x20a   :  { %v532_v0 = vpop.f32.mrf.mxu0  ;;  %v603_v10 = vpop.f32.mrf.mxu1 }
 0x20b   :  { %v533_v55 = vadd.f32 %v532_v0, %v3364_v53  ;;  %v604_v0 = vadd.f32 %v603_v10, %v2717_v9  ;;  %v3367_v10 = vld [vmem:[#allocation15_spill] sm:$0xff] }
 0x20c   :  { %v534_v50 = vpop.f32.mrf.mxu0  ;;  %v1966_v4 = vpop.f32.mrf.mxu1 }
 0x20d   :  { %v608_v6 = vrot.slane %v533_v55, 7  ;;  %v535_v60 = vadd.f32 %v534_v50, %v2709_v1  ;;  %v628_v4 = vrot.slane %v604_v0, 7  ;;  %v3370_v0 = vld [vmem:[#allocation17_spill] sm:$0xff] }
 0x20f   :  { %v610_v3 = vadd.f32 %v608_v6, %v2707_v23  ;;  %v618_v2 = vrot.slane %v535_v60, 7 }
 0x211   :  { %v1731_v18 = vmul.f32 -1.442695, %v610_v3  ;;  %v620_v20 = vadd.f32 %v618_v2, %v2714_v61  ;;  %v3369_v3 = vld [vmem:[#allocation16_spill] sm:$0xff] }
 0x213   :  { %2195 = vpow2.f32 %v1731_v18  ;;  %v1732_v8 = vmul.f32 -1.442695, %v620_v20  ;;  %v636_v18 = vrot.slane %v2724_v7, 7 }
 0x215   :  { %2197 = vpow2.f32 %v1732_v8 }
 0x220   :  { %v2196_v62 = vpop.eup %2195 }
 0x221   :  { %v614_v5 = vadd.f32 1.0, %v2196_v62 }
 0x222   :  { %v2198_v63 = vpop.eup %2197 }
 0x223   :  { %2199 = vrcp.f32 %v614_v5  ;;  %v624_v53 = vadd.f32 1.0, %v2198_v63  ;;  %v3366_v63 = vld [vmem:[#allocation14_spill] sm:$0xff] }
 0x225   :  { %2201 = vrcp.f32 %v624_v53  ;;  %v3368_v53 = vld [vmem:[#allocation19_spill] sm:$0xff] }
 0x230   :  { %v2200_v55 = vpop.eup %2199 }
 0x231   :  { %v630_v56 = vmul.f32 %v2200_v55, %v628_v4  ;;  %v3371_v4 = vld [vmem:[#allocation20_spill] sm:$0xff] }
 0x232   :  { %v2202_v6 = vpop.eup %2201  ;;  %v3372_v55 = vld [vmem:[#allocation12_spill] sm:$0xff] }
 0x233   :  { %v631_v50 = vadd.f32 %v630_v56, %v2720_v16  ;;  %v633_v2 = vsub.f32 1.0, %v2202_v6  ;;  %v638_v60 = vmul.f32 %v2202_v6, %v636_v18  ;;  %v3365_v56 = vld [vmem:[#allocation18_spill] sm:$0xff]  ;;  %v3373_v18 = vld [vmem:[#allocation21_spill] sm:$0xff] }
 0x235   :  { %2203 = vtanh.f32 %v631_v50 }
 0x242   :  { %v2204_v20 = vpop.eup %2203 }
 0x243   :  { %v634_v8 = vmul.f32 %v2204_v20, %v633_v2 }
 0x245   :  { %v2802_v62 = vadd.f32 %v638_v60, %v634_v8 }
 0x247   :  { %v641_v5 = vrot.slane %v2802_v62, 1 }
 0x249   :  { %708 = vmatmul.mubr.f32.vlgmr.msra.gmra.mxu0 %v641_v5  ;;  %2000 = vmatmul.mubr.f32.vlgmr.msra.gmra.mxu1 %v641_v5 }
 0x24a   :  { %820 = vmatpush1.msra.mxu0 %v2457_v11  ;;  %2003 = vmatpush3.msra.mxu1 %v2496_v27 }
 0x24b   :  { %821 = vmatprep.subr.mxu0 %v2459_v12  ;;  %2004 = vmatprep.subr.mxu1 %v3355_v52 }
 0x24c   :  { %822 = vmatpush1.msra.mxu0 %v2463_v13  ;;  %2005 = vmatpush3.msra.mxu1 %v2506_v30 }
 0x24d   :  { %823 = vmatprep.subr.mxu0 %v2466_v14  ;;  %2006 = vmatprep.subr.mxu1 %v3355_v52 }
 0x24e   :  { %824 = vmatpush1.msra.mxu0 %v2470_v15  ;;  %2007 = vmatpush3.msra.mxu1 %v2516_v33 }
 0x24f   :  { %825 = vmatprep.subr.mxu0 %v2473_v17  ;;  %2008 = vmatprep.subr.mxu1 %v3355_v52 }
 0x250   :  { %826 = vmatpush1.msra.mxu0 %v2476_v19  ;;  %2009 = vmatpush3.msra.mxu1 %v2526_v36 }
 0x251   :  { %827 = vmatprep.subr.mxu0 %v2480_v21  ;;  %2010 = vmatprep.subr.mxu1 %v3355_v52 }
 0x252   :  { %828 = vmatpush1.msra.mxu0 %v2483_v22  ;;  %2011 = vmatpush3.msra.mxu1 %v2536_v39 }
 0x253   :  { %829 = vmatprep.subr.mxu0 %v2487_v24  ;;  %2012 = vmatprep.subr.mxu1 %v3355_v52 }
 0x254   :  { %830 = vmatpush1.msra.mxu0 %v2490_v25  ;;  %2013 = vmatpush3.msra.mxu1 %v2546_v42 }
 0x255   :  { %831 = vmatprep.subr.mxu0 %v2494_v26  ;;  %2014 = vmatprep.subr.mxu1 %v3355_v52 }
 0x256   :  { %832 = vmatpush1.msra.mxu0 %v2499_v28  ;;  %2015 = vmatpush3.msra.mxu1 %v2556_v45 }
 0x257   :  { %833 = vmatprep.subr.mxu0 %v2503_v29  ;;  %2016 = vmatprep.subr.mxu1 %v3355_v52 }
 0x258   :  { %834 = vmatpush1.msra.mxu0 %v2509_v31  ;;  %2017 = vmatpush3.msra.mxu1 %v2566_v48 }
 0x259   :  { %835 = vmatprep.subr.mxu0 %v2513_v32  ;;  %2018 = vmatprep.subr.mxu1 %v3355_v52 }
 0x25a   :  { %836 = vmatpush1.msra.mxu0 %v2519_v34  ;;  %2019 = vmatpush3.msra.mxu1 %v2576_v51 }
 0x25b   :  { %837 = vmatprep.subr.mxu0 %v2523_v35  ;;  %2020 = vmatprep.subr.mxu1 %v3355_v52 }
 0x25c   :  { %838 = vmatpush1.msra.mxu0 %v2529_v37  ;;  %2021 = vmatpush3.msra.mxu1 %v2586_v54 }
 0x25d   :  { %839 = vmatprep.subr.mxu0 %v2533_v38  ;;  %2022 = vmatprep.subr.mxu1 %v3355_v52 }
 0x25e   :  { %840 = vmatpush1.msra.mxu0 %v2539_v40  ;;  %2023 = vmatpush3.msra.mxu1 %v2599_v57 }
 0x25f   :  { %841 = vmatprep.subr.mxu0 %v2543_v41  ;;  %2024 = vmatprep.subr.mxu1 %v3355_v52 }
 0x260   :  { %842 = vmatpush1.msra.mxu0 %v2549_v43  ;;  %2025 = vmatpush3.msra.mxu1 %v2605_v58 }
 0x261   :  { %843 = vmatprep.subr.mxu0 %v2553_v44  ;;  %2026 = vmatprep.subr.mxu1 %v3355_v52 }
 0x262   :  { %844 = vmatpush1.msra.mxu0 %v2559_v46  ;;  %2027 = vmatpush3.msra.mxu1 %v2610_v59 }
 0x263   :  { %845 = vmatprep.subr.mxu0 %v2563_v47  ;;  %2028 = vmatprep.subr.mxu1 %v3355_v52 }
 0x264   :  { %846 = vmatpush1.msra.mxu0 %v2569_v49  ;;  %2029 = vmatpush3.msra.mxu1 %v3365_v56 }
 0x265   :  { %847 = vmatprep.subr.mxu0 %v3366_v63  ;;  %2030 = vmatprep.subr.mxu1 %v3355_v52 }
 0x266   :  { %848 = vmatpush1.msra.mxu0 %v3367_v10  ;;  %2031 = vmatpush3.msra.mxu1 %v3368_v53 }
 0x267   :  { %849 = vmatprep.subr.mxu0 %v3369_v3  ;;  %2032 = vmatprep.subr.mxu1 %v3355_v52 }
 0x268   :  { %850 = vmatpush1.msra.mxu0 %v3370_v0  ;;  %883 = vmatprep.mubr.f32.mxu0 %v3355_v52 }
 0x269   :  { %2033 = vmatpush3.msra.mxu1 %v3371_v4  ;;  %2034 = vmatprep.mubr.msk.f32.mxu1 %vm2405_vm0, %v3355_v52 }
 0x26a   :  { %995 = vmatprep.subr.mxu0 %v3372_v55  ;;  %2037 = vmatprep.subr.mxu1 %v3355_v52 }
 0x309   :  { %v709_v50 = vpop.f32.mrf.mxu0  ;;  %v780_v6 = vpop.f32.mrf.mxu1 }
 0x30a   :  { %v710_v2 = vadd.f32 %v709_v50, %v3373_v18  ;;  %v781_v50 = vadd.f32 %v780_v6, %v2717_v9 }
 0x30b   :  { %v711_v20 = vpop.f32.mrf.mxu0  ;;  %v2001_v8 = vpop.f32.mrf.mxu1 }
 0x30c   :  { %v785_v60 = vrot.slane %v710_v2, 6  ;;  %v712_v5 = vadd.f32 %v711_v20, %v2709_v1  ;;  %v805_v8 = vrot.slane %v781_v50, 6 }
 0x30e   :  { %v787_v0 = vadd.f32 %v785_v60, %v2707_v23  ;;  %v795_v4 = vrot.slane %v712_v5, 6 }
 0x310   :  { %v1733_v3 = vmul.f32 -1.442695, %v787_v0  ;;  %v797_v53 = vadd.f32 %v795_v4, %v2714_v61  ;;  %v812_v4 = vrot.slane %v2802_v62, 7 }
 0x312   :  { %2205 = vpow2.f32 %v1733_v3  ;;  %v1734_v10 = vmul.f32 -1.442695, %v797_v53 }
 0x314   :  { %2207 = vpow2.f32 %v1734_v10 }
 0x31f   :  { %v2206_v55 = vpop.eup %2205 }
 0x320   :  { %v791_v63 = vadd.f32 1.0, %v2206_v55 }
 0x321   :  { %v2208_v56 = vpop.eup %2207 }
 0x322   :  { %2209 = vrcp.f32 %v791_v63  ;;  %v801_v18 = vadd.f32 1.0, %v2208_v56  ;;  %v1697_v56 = vsel %vm1696_vm2, %v2724_v7, %v2802_v62 }
 0x324   :  { %2211 = vrcp.f32 %v801_v18 }
 0x32f   :  { %v2210_v2 = vpop.eup %2209 }
 0x330   :  { %v807_v49 = vmul.f32 %v2210_v2, %v805_v8 }
 0x331   :  { %v2212_v0 = vpop.eup %2211 }
 0x332   :  { %v808_v20 = vadd.f32 %v807_v49, %v2720_v16  ;;  %v810_v3 = vsub.f32 1.0, %v2212_v0  ;;  %v814_v60 = vmul.f32 %v2212_v0, %v812_v4  ;;  %v2970_v0 = vld [vmem:[#allocation7 + $0x168] sm:$0xff]  ;;  %v2976_v4 = vld [vmem:[#allocation7 + $0x158] sm:$0xff] }
 0x334   :  { %2213 = vtanh.f32 %v808_v20 }
 0x341   :  { %v2214_v53 = vpop.eup %2213 }
 0x342   :  { %v811_v10 = vmul.f32 %v2214_v53, %v810_v3  ;;  %v2973_v3 = vld [vmem:[#allocation7 + $0x178] sm:$0xff]  ;;  %v2980_v53 = vld [vmem:[#allocation7 + $0x150] sm:$0xff] }
 0x344   :  { %v2879_v63 = vadd.f32 %v814_v60, %v811_v10  ;;  %v2983_v10 = vld [vmem:[#allocation7 + $0x160] sm:$0xff] }
 0x345   :  { %v2986_v60 = vld [vmem:[#allocation7 + $0x140] sm:$0xff] }
 0x346   :  { %v817_v6 = vrot.slane %v2879_v63, 2  ;;  %v2885_v18 = vsel %vm1698_vm3, %v1697_v56, %v2879_v63  ;;  %v988_v62 = vrot.slane %v2879_v63, 7  ;;  %v2990_v63 = vld [vmem:[#allocation7 + $0x138] sm:$0xff]  ;;  %v2993_v56 = vld [vmem:[#allocation7 + $0x148] sm:$0xff] }
 0x348   :  { %884 = vmatmul.mubr.f32.vlgmr.msra.gmra.mxu0 %v817_v6  ;;  %2035 = vmatmul.mubr.f32.vlgmr.msra.gmra.mxu1 %v817_v6  ;;  %v2996_v6 = vld [vmem:[#allocation7 + $0x128] sm:$0xff] }
 0x349   :  { %996 = vmatpush1.msra.mxu0 %v2457_v11  ;;  %2038 = vmatpush3.msra.mxu1 %v2496_v27  ;;  %v3374_v11 = vld [vmem:[#allocation13_spill] sm:$0xff] }
 0x34a   :  { %997 = vmatprep.subr.mxu0 %v2459_v12  ;;  %2039 = vmatprep.subr.mxu1 %v3355_v52  ;;  %v3375_v12 = vld [vmem:[#allocation18_spill] sm:$0xff] }
 0x34b   :  { %998 = vmatpush1.msra.mxu0 %v2463_v13  ;;  %2040 = vmatpush3.msra.mxu1 %v2506_v30  ;;  %v3376_v13 = vld [vmem:[#allocation14_spill] sm:$0xff] }
 0x34c   :  { %999 = vmatprep.subr.mxu0 %v2466_v14  ;;  %2041 = vmatprep.subr.mxu1 %v3355_v52  ;;  %v3377_v14 = vld [vmem:[#allocation15_spill] sm:$0xff] }
 0x34d   :  { %1000 = vmatpush1.msra.mxu0 %v2470_v15  ;;  %2042 = vmatpush3.msra.mxu1 %v2516_v33  ;;  %v3378_v15 = vld [vmem:[#allocation19_spill] sm:$0xff] }
 0x34e   :  { %1001 = vmatprep.subr.mxu0 %v2473_v17  ;;  %2043 = vmatprep.subr.mxu1 %v3355_v52  ;;  %v3379_v17 = vld [vmem:[#allocation16_spill] sm:$0xff] }
 0x34f   :  { %1002 = vmatpush1.msra.mxu0 %v2476_v19  ;;  %2044 = vmatpush3.msra.mxu1 %v2526_v36  ;;  %v3380_v19 = vld [vmem:[#allocation17_spill] sm:$0xff] }
 0x350   :  { %1003 = vmatprep.subr.mxu0 %v2480_v21  ;;  %2045 = vmatprep.subr.mxu1 %v3355_v52  ;;  %v3381_v21 = vld [vmem:[#allocation20_spill] sm:$0xff] }
 0x351   :  { %1004 = vmatpush1.msra.mxu0 %v2483_v22  ;;  %2046 = vmatpush3.msra.mxu1 %v2536_v39  ;;  %v2952_v22 = vld [vmem:[#allocation7 + $0x170] sm:$0xff] }
 0x352   :  { %1005 = vmatprep.subr.mxu0 %v2487_v24  ;;  %2047 = vmatprep.subr.mxu1 %v3355_v52 }
 0x353   :  { %1006 = vmatpush1.msra.mxu0 %v2490_v25  ;;  %2048 = vmatpush3.msra.mxu1 %v2546_v42 }
 0x354   :  { %1007 = vmatprep.subr.mxu0 %v2494_v26  ;;  %2049 = vmatprep.subr.mxu1 %v3355_v52  ;;  %v3382_v26 = vld [vmem:[#allocation21_spill] sm:$0xff] }
 0x355   :  { %1008 = vmatpush1.msra.mxu0 %v2499_v28  ;;  %2050 = vmatpush3.msra.mxu1 %v2556_v45 }
 0x356   :  { %1009 = vmatprep.subr.mxu0 %v2503_v29  ;;  %2051 = vmatprep.subr.mxu1 %v3355_v52 }
 0x357   :  { %1010 = vmatpush1.msra.mxu0 %v2509_v31  ;;  %2052 = vmatpush3.msra.mxu1 %v2566_v48 }
 0x358   :  { %1011 = vmatprep.subr.mxu0 %v2513_v32  ;;  %2053 = vmatprep.subr.mxu1 %v3355_v52 }
 0x359   :  { %1012 = vmatpush1.msra.mxu0 %v2519_v34  ;;  %2054 = vmatpush3.msra.mxu1 %v2576_v51 }
 0x35a   :  { %1013 = vmatprep.subr.mxu0 %v2523_v35  ;;  %2055 = vmatprep.subr.mxu1 %v3355_v52 }
 0x35b   :  { %1014 = vmatpush1.msra.mxu0 %v2529_v37  ;;  %2056 = vmatpush3.msra.mxu1 %v2586_v54 }
 0x35c   :  { %1015 = vmatprep.subr.mxu0 %v2533_v38  ;;  %2057 = vmatprep.subr.mxu1 %v3355_v52 }
 0x35d   :  { %1016 = vmatpush1.msra.mxu0 %v2539_v40  ;;  %2058 = vmatpush3.msra.mxu1 %v2599_v57 }
 0x35e   :  { %1017 = vmatprep.subr.mxu0 %v2543_v41  ;;  %2059 = vmatprep.subr.mxu1 %v3355_v52 }
 0x35f   :  { %1018 = vmatpush1.msra.mxu0 %v2549_v43  ;;  %2060 = vmatpush3.msra.mxu1 %v2605_v58 }
 0x360   :  { %1019 = vmatprep.subr.mxu0 %v2553_v44  ;;  %2061 = vmatprep.subr.mxu1 %v3355_v52 }
 0x361   :  { %1020 = vmatpush1.msra.mxu0 %v2559_v46  ;;  %2062 = vmatpush3.msra.mxu1 %v2610_v59 }
 0x362   :  { %1021 = vmatprep.subr.mxu0 %v2563_v47  ;;  %2063 = vmatprep.subr.mxu1 %v3355_v52 }
 0x363   :  { %1022 = vmatpush1.msra.mxu0 %v3374_v11  ;;  %2064 = vmatpush3.msra.mxu1 %v3375_v12  ;;  %v3003_v11 = vld [vmem:[#allocation7 + $0x130] sm:$0xff] }
 0x364   :  { %1023 = vmatprep.subr.mxu0 %v3376_v13  ;;  %2065 = vmatprep.subr.mxu1 %v3355_v52  ;;  %v3006_v13 = vld [vmem:[#allocation7 + $0x110] sm:$0xff] }
 0x365   :  { %1024 = vmatpush1.msra.mxu0 %v3377_v14  ;;  %2066 = vmatpush3.msra.mxu1 %v3378_v15  ;;  %v3010_v14 = vld [vmem:[#allocation7 + $0x108] sm:$0xff] }
 0x366   :  { %1025 = vmatprep.subr.mxu0 %v3379_v17  ;;  %2067 = vmatprep.subr.mxu1 %v3355_v52  ;;  %v3013_v17 = vld [vmem:[#allocation7 + $0x118] sm:$0xff] }
 0x367   :  { %1026 = vmatpush1.msra.mxu0 %v3380_v19  ;;  %1059 = vmatprep.mubr.f32.mxu0 %v3355_v52  ;;  %v3016_v19 = vld [vmem:[#allocation7 + $0xf8] sm:$0xff] }
 0x368   :  { %2068 = vmatpush3.msra.mxu1 %v3381_v21  ;;  %2069 = vmatprep.mubr.msk.f32.mxu1 %vm2405_vm0, %v3355_v52 }
 0x369   :  { %1171 = vmatprep.subr.mxu0 %v2952_v22  ;;  %2072 = vmatprep.subr.mxu1 %v3355_v52 }
 0x408   :  { %v885_v24 = vpop.f32.mrf.mxu0  ;;  %v956_v25 = vpop.f32.mrf.mxu1 }
 0x409   :  { %v886_v27 = vadd.f32 %v885_v24, %v3382_v26  ;;  %v957_v40 = vadd.f32 %v956_v25, %v2717_v9  ;;  %v3020_v24 = vld [vmem:[#allocation7 + $0xf0] sm:$0xff]  ;;  %v3024_v25 = vld [vmem:[#allocation7 + $0xe0] sm:$0xff] }
 0x40a   :  { %v887_v28 = vpop.f32.mrf.mxu0  ;;  %v2036_v29 = vpop.f32.mrf.mxu1 }
 0x40b   :  { %v961_v30 = vrot.slane %v886_v27, 5  ;;  %v888_v31 = vadd.f32 %v887_v28, %v2709_v1  ;;  %v981_v43 = vrot.slane %v957_v40, 5  ;;  %v3028_v27 = vld [vmem:[#allocation7 + $0xd8] sm:$0xff]  ;;  %v3032_v28 = vld [vmem:[#allocation7 + $0xc8] sm:$0xff]  ;;  %v3036_v29 = vld [vmem:[#allocation7 + $0xc0] sm:$0xff] }
 0x40d   :  { %v963_v32 = vadd.f32 %v961_v30, %v2707_v23  ;;  %v971_v34 = vrot.slane %v888_v31, 5  ;;  %v3044_v30 = vld [vmem:[#allocation7 + $0xa8] sm:$0xff]  ;;  %v3052_v31 = vld [vmem:[#allocation7 + $0x90] sm:$0xff] }
 0x40f   :  { %v1735_v33 = vmul.f32 -1.442695, %v963_v32  ;;  %v973_v35 = vadd.f32 %v971_v34, %v2714_v61  ;;  %v3060_v32 = vld [vmem:[#allocation7 + $0x78] sm:$0xff]  ;;  %v3076_v34 = vld [vmem:[#allocation7 + $0x48] sm:$0xff] }
 0x411   :  { %2215 = vpow2.f32 %v1735_v33  ;;  %v1736_v36 = vmul.f32 -1.442695, %v973_v35  ;;  %v3068_v33 = vld [vmem:[#allocation7 + $0x60] sm:$0xff]  ;;  %v3084_v35 = vld [vmem:[#allocation7 + $0x30] sm:$0xff] }
 0x412   :  { %3383 = vst [vmem:[#allocation12_spill] sm:$0xff] %v3084_v35 }
 0x413   :  { %2217 = vpow2.f32 %v1736_v36  ;;  %v3092_v36 = vld [vmem:[#allocation7 + $0x18] sm:$0xff] }
 0x414   :  { %3385 = vst [vmem:[#allocation18_spill] sm:$0xff] %v3092_v36 }
 0x41e   :  { %v2216_v37 = vpop.eup %2215 }
 0x41f   :  { %v967_v38 = vadd.f32 1.0, %v2216_v37  ;;  %v3100_v37 = vld [vmem:[#allocation7] sm:$0xff] }
 0x420   :  { %v2218_v39 = vpop.eup %2217  ;;  %3387 = vst [vmem:[#allocation15_spill] sm:$0xff] %v3100_v37 }
 0x421   :  { %2219 = vrcp.f32 %v967_v38  ;;  %v977_v41 = vadd.f32 1.0, %v2218_v39 }
 0x423   :  { %2221 = vrcp.f32 %v977_v41 }
 0x42e   :  { %v2220_v44 = vpop.eup %2219 }
 0x42f   :  { %v983_v46 = vmul.f32 %v2220_v44, %v981_v43 }
 0x430   :  { %v2222_v49 = vpop.eup %2221 }
 0x431   :  { %v984_v47 = vadd.f32 %v983_v46, %v2720_v16  ;;  %v986_v7 = vsub.f32 1.0, %v2222_v49  ;;  %v990_v50 = vmul.f32 %v2222_v49, %v988_v62 }
 0x433   :  { %2223 = vtanh.f32 %v984_v47 }
 0x440   :  { %v2224_v5 = vpop.eup %2223 }
 0x441   :  { %v987_v55 = vmul.f32 %v2224_v5, %v986_v7 }
 0x443   :  { %v2963_v8 = vadd.f32 %v990_v50, %v987_v55 }
 0x445   :  { %v993_v2 = vrot.slane %v2963_v8, 3  ;;  %v2968_v20 = vsel %vm1700_vm4, %v2885_v18, %v2963_v8  ;;  %v3000_v18 = vld [vmem:[#allocation7 + $0x120] sm:$0xff] }
 0x447   :  { %1060 = vmatmul.mubr.f32.vlgmr.msra.gmra.mxu0 %v993_v2  ;;  %2070 = vmatmul.mubr.f32.vlgmr.msra.gmra.mxu1 %v993_v2 }
 0x448   :  { %1172 = vmatpush1.msra.mxu0 %v2970_v0  ;;  %2073 = vmatpush3.msra.mxu1 %v2973_v3 }
 0x449   :  { %1173 = vmatprep.subr.mxu0 %v2976_v4  ;;  %2074 = vmatprep.subr.mxu1 %v3355_v52 }
 0x44a   :  { %1174 = vmatpush1.msra.mxu0 %v2980_v53  ;;  %2075 = vmatpush3.msra.mxu1 %v2983_v10 }
 0x44b   :  { %1175 = vmatprep.subr.mxu0 %v2986_v60  ;;  %2076 = vmatprep.subr.mxu1 %v3355_v52 }
 0x44c   :  { %1176 = vmatpush1.msra.mxu0 %v2990_v63  ;;  %2077 = vmatpush3.msra.mxu1 %v2993_v56 }
 0x44d   :  { %1177 = vmatprep.subr.mxu0 %v2996_v6  ;;  %2078 = vmatprep.subr.mxu1 %v3355_v52 }
 0x44e   :  { %1178 = vmatpush1.msra.mxu0 %v3000_v18  ;;  %2079 = vmatpush3.msra.mxu1 %v3003_v11 }
 0x44f   :  { %1179 = vmatprep.subr.mxu0 %v3006_v13  ;;  %2080 = vmatprep.subr.mxu1 %v3355_v52 }
 0x450   :  { %1180 = vmatpush1.msra.mxu0 %v3010_v14  ;;  %2081 = vmatpush3.msra.mxu1 %v3013_v17 }
 0x451   :  { %1181 = vmatprep.subr.mxu0 %v3016_v19  ;;  %2082 = vmatprep.subr.mxu1 %v3355_v52 }
 0x452   :  { %1182 = vmatpush1.msra.mxu0 %v3020_v24  ;;  %2083 = vmatpush3.msra.mxu1 %v2546_v42  ;;  %v3040_v42 = vld [vmem:[#allocation7 + $0xb0] sm:$0xff] }
 0x453   :  { %1183 = vmatprep.subr.mxu0 %v3024_v25  ;;  %2084 = vmatprep.subr.mxu1 %v3355_v52 }
 0x454   :  { %1184 = vmatpush1.msra.mxu0 %v3028_v27  ;;  %2085 = vmatpush3.msra.mxu1 %v2556_v45  ;;  %v3048_v45 = vld [vmem:[#allocation7 + $0x98] sm:$0xff] }
 0x455   :  { %1185 = vmatprep.subr.mxu0 %v3032_v28  ;;  %2086 = vmatprep.subr.mxu1 %v3355_v52 }
 0x456   :  { %1186 = vmatpush1.msra.mxu0 %v3036_v29  ;;  %2087 = vmatpush3.msra.mxu1 %v2566_v48  ;;  %v3056_v48 = vld [vmem:[#allocation7 + $0x80] sm:$0xff] }
 0x457   :  { %1187 = vmatprep.subr.mxu0 %v3040_v42  ;;  %2088 = vmatprep.subr.mxu1 %v3355_v52 }
 0x458   :  { %1188 = vmatpush1.msra.mxu0 %v3044_v30  ;;  %2089 = vmatpush3.msra.mxu1 %v2576_v51  ;;  %v3064_v51 = vld [vmem:[#allocation7 + $0x68] sm:$0xff] }
 0x459   :  { %1189 = vmatprep.subr.mxu0 %v3048_v45  ;;  %2090 = vmatprep.subr.mxu1 %v3355_v52 }
 0x45a   :  { %1190 = vmatpush1.msra.mxu0 %v3052_v31  ;;  %2091 = vmatpush3.msra.mxu1 %v2586_v54  ;;  %v3072_v54 = vld [vmem:[#allocation7 + $0x50] sm:$0xff] }
 0x45b   :  { %1191 = vmatprep.subr.mxu0 %v3056_v48  ;;  %2092 = vmatprep.subr.mxu1 %v3355_v52 }
 0x45c   :  { %1192 = vmatpush1.msra.mxu0 %v3060_v32  ;;  %2093 = vmatpush3.msra.mxu1 %v2599_v57  ;;  %v3080_v57 = vld [vmem:[#allocation7 + $0x38] sm:$0xff] }
 0x45d   :  { %1193 = vmatprep.subr.mxu0 %v3064_v51  ;;  %2094 = vmatprep.subr.mxu1 %v3355_v52 }
 0x45e   :  { %1194 = vmatpush1.msra.mxu0 %v3068_v33  ;;  %2095 = vmatpush3.msra.mxu1 %v2605_v58  ;;  %v3088_v58 = vld [vmem:[#allocation7 + $0x20] sm:$0xff] }
 0x45f   :  { %1195 = vmatprep.subr.mxu0 %v3072_v54  ;;  %2096 = vmatprep.subr.mxu1 %v3355_v52  ;;  %3384 = vst [vmem:[#allocation13_spill] sm:$0xff] %v3088_v58 }
 0x460   :  { %1196 = vmatpush1.msra.mxu0 %v3076_v34  ;;  %2097 = vmatpush3.msra.mxu1 %v2610_v59  ;;  %v3096_v59 = vld [vmem:[#allocation7 + $0x8] sm:$0xff] }
 0x461   :  { %1197 = vmatprep.subr.mxu0 %v3080_v57  ;;  %2098 = vmatprep.subr.mxu1 %v3355_v52  ;;  %3386 = vst [vmem:[#allocation14_spill] sm:$0xff] %v3096_v59 }
 0x462   :  { %1198 = vmatpush1.msra.mxu0 %v3084_v35  ;;  %2099 = vmatpush3.msra.mxu1 %v3375_v12 }
 0x463   :  { %1199 = vmatprep.subr.mxu0 %v3088_v58  ;;  %2100 = vmatprep.subr.mxu1 %v3355_v52 }
 0x464   :  { %1200 = vmatpush1.msra.mxu0 %v3092_v36  ;;  %2101 = vmatpush3.msra.mxu1 %v3378_v15 }
 0x465   :  { %1201 = vmatprep.subr.mxu0 %v3096_v59  ;;  %2102 = vmatprep.subr.mxu1 %v3355_v52 }
 0x466   :  { %1202 = vmatpush1.msra.mxu0 %v3100_v37  ;;  %1235 = vmatprep.mubr.f32.mxu0 %v3355_v52 }
 0x467   :  { %2103 = vmatpush3.msra.mxu1 %v3381_v21  ;;  %2104 = vmatprep.mubr.msk.f32.mxu1 %vm2405_vm0, %v3355_v52 }
 0x468   :  { %1347 = vmatprep.subr.mxu0 %v2952_v22  ;;  %2107 = vmatprep.subr.mxu1 %v3355_v52 }
 0x507   :  { %v1061_v12 = vpop.f32.mrf.mxu0  ;;  %v1132_v15 = vpop.f32.mrf.mxu1 }
 0x508   :  { %v1062_v38 = vadd.f32 %v1061_v12, %v3382_v26  ;;  %v1133_v55 = vadd.f32 %v1132_v15, %v2717_v9 }
 0x509   :  { %v1063_v39 = vpop.f32.mrf.mxu0  ;;  %v2071_v40 = vpop.f32.mrf.mxu1 }
 0x50a   :  { %v1137_v41 = vrot.slane %v1062_v38, 4  ;;  %v1064_v43 = vadd.f32 %v1063_v39, %v2709_v1  ;;  %v1157_v2 = vrot.slane %v1133_v55, 4  ;;  %v3174_v55 = vld [vmem:[#allocation7 + $0x88] sm:$0xff] }
 0x50c   :  { %v1139_v44 = vadd.f32 %v1137_v41, %v2707_v23  ;;  %v1147_v21 = vrot.slane %v1064_v43, 4  ;;  %v1164_v43 = vrot.slane %v2963_v8, 7  ;;  %v3144_v8 = vld [vmem:[#allocation7 + $0x100] sm:$0xff] }
 0x50e   :  { %v1737_v46 = vmul.f32 -1.442695, %v1139_v44  ;;  %v1149_v47 = vadd.f32 %v1147_v21, %v2714_v61 }
 0x510   :  { %2225 = vpow2.f32 %v1737_v46  ;;  %v1738_v49 = vmul.f32 -1.442695, %v1149_v47 }
 0x512   :  { %2227 = vpow2.f32 %v1738_v49 }
 0x51d   :  { %v2226_v7 = vpop.eup %2225 }
 0x51e   :  { %v1143_v62 = vadd.f32 1.0, %v2226_v7  ;;  %v3156_v7 = vld [vmem:[#allocation7 + $0xd0] sm:$0xff] }
 0x51f   :  { %v2228_v5 = vpop.eup %2227 }
 0x520   :  { %2229 = vrcp.f32 %v1143_v62  ;;  %v1153_v50 = vadd.f32 1.0, %v2228_v5  ;;  %v3162_v62 = vld [vmem:[#allocation7 + $0xb8] sm:$0xff]  ;;  %v3168_v5 = vld [vmem:[#allocation7 + $0xa0] sm:$0xff] }
 0x522   :  { %2231 = vrcp.f32 %v1153_v50  ;;  %v3180_v50 = vld [vmem:[#allocation7 + $0x70] sm:$0xff] }
 0x52d   :  { %v2230_v12 = vpop.eup %2229 }
 0x52e   :  { %v1159_v38 = vmul.f32 %v2230_v12, %v1157_v2  ;;  %v3186_v2 = vld [vmem:[#allocation7 + $0x58] sm:$0xff]  ;;  %v3192_v12 = vld [vmem:[#allocation7 + $0x40] sm:$0xff] }
 0x52f   :  { %v2232_v40 = vpop.eup %2231  ;;  %3388 = vst [vmem:[#allocation19_spill] sm:$0xff] %v3192_v12 }
 0x530   :  { %v1160_v39 = vadd.f32 %v1159_v38, %v2720_v16  ;;  %v1162_v41 = vsub.f32 1.0, %v2232_v40  ;;  %v1166_v21 = vmul.f32 %v2232_v40, %v1164_v43  ;;  %v3198_v38 = vld [vmem:[#allocation7 + $0x28] sm:$0xff] }
 0x531   :  { %3389 = vst [vmem:[#allocation16_spill] sm:$0xff] %v3198_v38 }
 0x532   :  { %2233 = vtanh.f32 %v1160_v39  ;;  %v3205_v39 = vld [vmem:[#allocation7 + $0x10] sm:$0xff] }
 0x533   :  { %3390 = vst [vmem:[#allocation17_spill] sm:$0xff] %v3205_v39 }
 0x53f   :  { %v2234_v44 = vpop.eup %2233 }
 0x540   :  { %v1163_v46 = vmul.f32 %v2234_v44, %v1162_v41 }
 0x542   :  { %v3116_v47 = vadd.f32 %v1166_v21, %v1163_v46 }
 0x544   :  { %v1169_v15 = vrot.slane %v3116_v47, 4  ;;  %v3121_v49 = vsel %vm1702_vm5, %v2968_v20, %v3116_v47  ;;  %v3150_v20 = vld [vmem:[#allocation7 + $0xe8] sm:$0xff] }
 0x546   :  { %1236 = vmatmul.mubr.f32.vlgmr.msra.gmra.mxu0 %v1169_v15  ;;  %2105 = vmatmul.mubr.f32.vlgmr.msra.gmra.mxu1 %v1169_v15 }
 0x547   :  { %1348 = vmatpush1.msra.mxu0 %v2970_v0  ;;  %2108 = vmatpush3.msra.mxu1 %v2973_v3 }
 0x548   :  { %1349 = vmatprep.subr.mxu0 %v2976_v4  ;;  %2109 = vmatprep.subr.mxu1 %v3355_v52 }
 0x549   :  { %1350 = vmatpush1.msra.mxu0 %v2980_v53  ;;  %2110 = vmatpush3.msra.mxu1 %v2983_v10 }
 0x54a   :  { %1351 = vmatprep.subr.mxu0 %v2986_v60  ;;  %2111 = vmatprep.subr.mxu1 %v3355_v52 }
 0x54b   :  { %1352 = vmatpush1.msra.mxu0 %v2990_v63  ;;  %2112 = vmatpush3.msra.mxu1 %v2993_v56 }
 0x54c   :  { %1353 = vmatprep.subr.mxu0 %v2996_v6  ;;  %2113 = vmatprep.subr.mxu1 %v3355_v52 }
 0x54d   :  { %1354 = vmatpush1.msra.mxu0 %v3000_v18  ;;  %2114 = vmatpush3.msra.mxu1 %v3003_v11 }
 0x54e   :  { %1355 = vmatprep.subr.mxu0 %v3006_v13  ;;  %2115 = vmatprep.subr.mxu1 %v3355_v52 }
 0x54f   :  { %1356 = vmatpush1.msra.mxu0 %v3010_v14  ;;  %2116 = vmatpush3.msra.mxu1 %v3013_v17 }
 0x550   :  { %1357 = vmatprep.subr.mxu0 %v3016_v19  ;;  %2117 = vmatprep.subr.mxu1 %v3355_v52 }
 0x551   :  { %1358 = vmatpush1.msra.mxu0 %v3020_v24  ;;  %2118 = vmatpush3.msra.mxu1 %v3144_v8 }
 0x552   :  { %1359 = vmatprep.subr.mxu0 %v3024_v25  ;;  %2119 = vmatprep.subr.mxu1 %v3355_v52 }
 0x553   :  { %1360 = vmatpush1.msra.mxu0 %v3028_v27  ;;  %2120 = vmatpush3.msra.mxu1 %v3150_v20 }
 0x554   :  { %1361 = vmatprep.subr.mxu0 %v3032_v28  ;;  %2121 = vmatprep.subr.mxu1 %v3355_v52 }
 0x555   :  { %1362 = vmatpush1.msra.mxu0 %v3036_v29  ;;  %2122 = vmatpush3.msra.mxu1 %v3156_v7 }
 0x556   :  { %1363 = vmatprep.subr.mxu0 %v3040_v42  ;;  %2123 = vmatprep.subr.mxu1 %v3355_v52 }
 0x557   :  { %1364 = vmatpush1.msra.mxu0 %v3044_v30  ;;  %2124 = vmatpush3.msra.mxu1 %v3162_v62 }
 0x558   :  { %1365 = vmatprep.subr.mxu0 %v3048_v45  ;;  %2125 = vmatprep.subr.mxu1 %v3355_v52 }
 0x559   :  { %1366 = vmatpush1.msra.mxu0 %v3052_v31  ;;  %2126 = vmatpush3.msra.mxu1 %v3168_v5 }
 0x55a   :  { %1367 = vmatprep.subr.mxu0 %v3056_v48  ;;  %2127 = vmatprep.subr.mxu1 %v3355_v52 }
 0x55b   :  { %1368 = vmatpush1.msra.mxu0 %v3060_v32  ;;  %2128 = vmatpush3.msra.mxu1 %v3174_v55 }
 0x55c   :  { %1369 = vmatprep.subr.mxu0 %v3064_v51  ;;  %2129 = vmatprep.subr.mxu1 %v3355_v52 }
 0x55d   :  { %1370 = vmatpush1.msra.mxu0 %v3068_v33  ;;  %2130 = vmatpush3.msra.mxu1 %v3180_v50 }
 0x55e   :  { %1371 = vmatprep.subr.mxu0 %v3072_v54  ;;  %2131 = vmatprep.subr.mxu1 %v3355_v52 }
 0x55f   :  { %1372 = vmatpush1.msra.mxu0 %v3076_v34  ;;  %2132 = vmatpush3.msra.mxu1 %v3186_v2 }
 0x560   :  { %1373 = vmatprep.subr.mxu0 %v3080_v57  ;;  %2133 = vmatprep.subr.mxu1 %v3355_v52 }
 0x561   :  { %1374 = vmatpush1.msra.mxu0 %v3084_v35  ;;  %2134 = vmatpush3.msra.mxu1 %v3192_v12 }
 0x562   :  { %1375 = vmatprep.subr.mxu0 %v3088_v58  ;;  %2135 = vmatprep.subr.mxu1 %v3355_v52 }
 0x563   :  { %1376 = vmatpush1.msra.mxu0 %v3092_v36  ;;  %2136 = vmatpush3.msra.mxu1 %v3198_v38 }
 0x564   :  { %1377 = vmatprep.subr.mxu0 %v3096_v59  ;;  %2137 = vmatprep.subr.mxu1 %v3355_v52 }
 0x565   :  { %1378 = vmatpush1.msra.mxu0 %v3100_v37  ;;  %1411 = vmatprep.mubr.f32.mxu0 %v3355_v52 }
 0x566   :  { %2138 = vmatpush3.msra.mxu1 %v3205_v39  ;;  %2139 = vmatprep.mubr.msk.f32.mxu1 %vm2405_vm0, %v3355_v52 }
 0x567   :  { %1523 = vmatprep.subr.mxu0 %v2952_v22  ;;  %2142 = vmatprep.subr.mxu1 %v3355_v52 }
 0x606   :  { %v1237_v40 = vpop.f32.mrf.mxu0  ;;  %v1308_v41 = vpop.f32.mrf.mxu1 }
 0x607   :  { %v1238_v43 = vadd.f32 %v1237_v40, %v3382_v26  ;;  %v1309_v40 = vadd.f32 %v1308_v41, %v2717_v9 }
 0x608   :  { %v1239_v44 = vpop.f32.mrf.mxu0  ;;  %v2106_v46 = vpop.f32.mrf.mxu1 }
 0x609   :  { %v1313_v21 = vrot.slane %v1238_v43, 3  ;;  %v1240_v15 = vadd.f32 %v1239_v44, %v2709_v1  ;;  %v1333_v46 = vrot.slane %v1309_v40, 3 }
 0x60b   :  { %v1315_v37 = vadd.f32 %v1313_v21, %v2707_v23  ;;  %v1323_v39 = vrot.slane %v1240_v15, 3 }
 0x60d   :  { %v1739_v59 = vmul.f32 -1.442695, %v1315_v37  ;;  %v1325_v38 = vadd.f32 %v1323_v39, %v2714_v61  ;;  %v1340_v39 = vrot.slane %v3116_v47, 7 }
 0x60f   :  { %2235 = vpow2.f32 %v1739_v59  ;;  %v1740_v36 = vmul.f32 -1.442695, %v1325_v38 }
 0x611   :  { %2237 = vpow2.f32 %v1740_v36 }
 0x61c   :  { %v2236_v22 = vpop.eup %2235 }
 0x61d   :  { %v1319_v58 = vadd.f32 1.0, %v2236_v22 }
 0x61e   :  { %v2238_v12 = vpop.eup %2237 }
 0x61f   :  { %2239 = vrcp.f32 %v1319_v58  ;;  %v1329_v26 = vadd.f32 1.0, %v2238_v12 }
 0x621   :  { %2241 = vrcp.f32 %v1329_v26  ;;  %v3391_v26 = vld [vmem:[#allocation12_spill] sm:$0xff] }
 0x62c   :  { %v2240_v43 = vpop.eup %2239 }
 0x62d   :  { %v1335_v35 = vmul.f32 %v2240_v43, %v1333_v46 }
 0x62e   :  { %v2242_v37 = vpop.eup %2241 }
 0x62f   :  { %v1336_v44 = vadd.f32 %v1335_v35, %v2720_v16  ;;  %v1338_v59 = vsub.f32 1.0, %v2242_v37  ;;  %v1342_v21 = vmul.f32 %v2242_v37, %v1340_v39 }
 0x631   :  { %2243 = vtanh.f32 %v1336_v44 }
 0x63e   :  { %v2244_v38 = vpop.eup %2243 }
 0x63f   :  { %v1339_v36 = vmul.f32 %v2244_v38, %v1338_v59 }
 0x641   :  { %v3219_v58 = vadd.f32 %v1342_v21, %v1339_v36 }
 0x643   :  { %v1345_v41 = vrot.slane %v3219_v58, 5  ;;  %v3224_v12 = vsel %vm1704_vm6, %v3121_v49, %v3219_v58 }
 0x645   :  { %1412 = vmatmul.mubr.f32.vlgmr.msra.gmra.mxu0 %v1345_v41  ;;  %2140 = vmatmul.mubr.f32.vlgmr.msra.gmra.mxu1 %v1345_v41 }
 0x646   :  { %1524 = vmatpush1.msra.mxu0 %v2970_v0  ;;  %2143 = vmatpush3.msra.mxu1 %v2973_v3  ;;  %v3392_v0 = vld [vmem:[#allocation19_spill] sm:$0xff]  ;;  %v3393_v3 = vld [vmem:[#allocation13_spill] sm:$0xff] }
 0x647   :  { %1525 = vmatprep.subr.mxu0 %v2976_v4  ;;  %2144 = vmatprep.subr.mxu1 %v3355_v52  ;;  %v3394_v4 = vld [vmem:[#allocation18_spill] sm:$0xff] }
 0x648   :  { %1526 = vmatpush1.msra.mxu0 %v2980_v53  ;;  %2145 = vmatpush3.msra.mxu1 %v2983_v10  ;;  %v3395_v53 = vld [vmem:[#allocation16_spill] sm:$0xff]  ;;  %v3396_v10 = vld [vmem:[#allocation14_spill] sm:$0xff] }
 0x649   :  { %1527 = vmatprep.subr.mxu0 %v2986_v60  ;;  %2146 = vmatprep.subr.mxu1 %v3355_v52  ;;  %v3397_v60 = vld [vmem:[#allocation15_spill] sm:$0xff] }
 0x64a   :  { %1528 = vmatpush1.msra.mxu0 %v2990_v63  ;;  %2147 = vmatpush3.msra.mxu1 %v2993_v56  ;;  %v3398_v63 = vld [vmem:[#allocation17_spill] sm:$0xff] }
 0x64b   :  { %1529 = vmatprep.subr.mxu0 %v2996_v6  ;;  %2148 = vmatprep.subr.mxu1 %v3355_v52 }
 0x64c   :  { %1530 = vmatpush1.msra.mxu0 %v3000_v18  ;;  %2149 = vmatpush3.msra.mxu1 %v3003_v11  ;;  %v3399_v18 = vld [vmem:[#allocation21_spill] sm:$0xff] }
 0x64d   :  { %1531 = vmatprep.subr.mxu0 %v3006_v13  ;;  %2150 = vmatprep.subr.mxu1 %v3355_v52 }
 0x64e   :  { %1532 = vmatpush1.msra.mxu0 %v3010_v14  ;;  %2151 = vmatpush3.msra.mxu1 %v3013_v17 }
 0x64f   :  { %1533 = vmatprep.subr.mxu0 %v3016_v19  ;;  %2152 = vmatprep.subr.mxu1 %v3355_v52 }
 0x650   :  { %1534 = vmatpush1.msra.mxu0 %v3020_v24  ;;  %2153 = vmatpush3.msra.mxu1 %v3144_v8 }
 0x651   :  { %1535 = vmatprep.subr.mxu0 %v3024_v25  ;;  %2154 = vmatprep.subr.mxu1 %v3355_v52 }
 0x652   :  { %1536 = vmatpush1.msra.mxu0 %v3028_v27  ;;  %2155 = vmatpush3.msra.mxu1 %v3150_v20 }
 0x653   :  { %1537 = vmatprep.subr.mxu0 %v3032_v28  ;;  %2156 = vmatprep.subr.mxu1 %v3355_v52 }
 0x654   :  { %1538 = vmatpush1.msra.mxu0 %v3036_v29  ;;  %2157 = vmatpush3.msra.mxu1 %v3156_v7 }
 0x655   :  { %1539 = vmatprep.subr.mxu0 %v3040_v42  ;;  %2158 = vmatprep.subr.mxu1 %v3355_v52 }
 0x656   :  { %1540 = vmatpush1.msra.mxu0 %v3044_v30  ;;  %2159 = vmatpush3.msra.mxu1 %v3162_v62 }
 0x657   :  { %1541 = vmatprep.subr.mxu0 %v3048_v45  ;;  %2160 = vmatprep.subr.mxu1 %v3355_v52 }
 0x658   :  { %1542 = vmatpush1.msra.mxu0 %v3052_v31  ;;  %2161 = vmatpush3.msra.mxu1 %v3168_v5 }
 0x659   :  { %1543 = vmatprep.subr.mxu0 %v3056_v48  ;;  %2162 = vmatprep.subr.mxu1 %v3355_v52 }
 0x65a   :  { %1544 = vmatpush1.msra.mxu0 %v3060_v32  ;;  %2163 = vmatpush3.msra.mxu1 %v3174_v55 }
 0x65b   :  { %1545 = vmatprep.subr.mxu0 %v3064_v51  ;;  %2164 = vmatprep.subr.mxu1 %v3355_v52 }
 0x65c   :  { %1546 = vmatpush1.msra.mxu0 %v3068_v33  ;;  %2165 = vmatpush3.msra.mxu1 %v3180_v50 }
 0x65d   :  { %1547 = vmatprep.subr.mxu0 %v3072_v54  ;;  %2166 = vmatprep.subr.mxu1 %v3355_v52 }
 0x65e   :  { %1548 = vmatpush1.msra.mxu0 %v3076_v34  ;;  %2167 = vmatpush3.msra.mxu1 %v3186_v2 }
 0x65f   :  { %1549 = vmatprep.subr.mxu0 %v3080_v57  ;;  %2168 = vmatprep.subr.mxu1 %v3355_v52  ;;  %v1516_v57 = vrot.slane %v3219_v58, 7 }
 0x660   :  { %1550 = vmatpush1.msra.mxu0 %v3391_v26  ;;  %2169 = vmatpush3.msra.mxu1 %v3392_v0 }
 0x661   :  { %1551 = vmatprep.subr.mxu0 %v3393_v3  ;;  %2170 = vmatprep.subr.mxu1 %v3355_v52 }
 0x662   :  { %1552 = vmatpush1.msra.mxu0 %v3394_v4  ;;  %2171 = vmatpush3.msra.mxu1 %v3395_v53 }
 0x663   :  { %1553 = vmatprep.subr.mxu0 %v3396_v10  ;;  %2172 = vmatprep.subr.mxu1 %v3355_v52 }
 0x664   :  { %1554 = vmatpush1.msra.mxu0 %v3397_v60  ;;  %1587 = vmatprep.mubr.f32.mxu0 %v3355_v52 }
 0x665   :  { %2173 = vmatpush3.msra.mxu1 %v3398_v63  ;;  %2174 = vmatprep.mubr.msk.f32.mxu1 %vm2405_vm0, %v3355_v52 }
 0x705   :  { %v1413_v56 = vpop.f32.mrf.mxu0  ;;  %v1484_v6 = vpop.f32.mrf.mxu1 }
 0x706   :  { %v1414_v11 = vadd.f32 %v1413_v56, %v3399_v18  ;;  %v1485_v45 = vadd.f32 %v1484_v6, %v2717_v9 }
 0x707   :  { %v1415_v13 = vpop.f32.mrf.mxu0  ;;  %v2141_v14 = vpop.f32.mrf.mxu1 }
 0x708   :  { %v1489_v17 = vrot.slane %v1414_v11, 2  ;;  %v1416_v19 = vadd.f32 %v1415_v13, %v2709_v1  ;;  %v1509_v48 = vrot.slane %v1485_v45, 2 }
 0x70a   :  { %v1491_v24 = vadd.f32 %v1489_v17, %v2707_v23  ;;  %v1499_v27 = vrot.slane %v1416_v19, 2 }
 0x70c   :  { %v1741_v25 = vmul.f32 -1.442695, %v1491_v24  ;;  %v1501_v28 = vadd.f32 %v1499_v27, %v2714_v61 }
 0x70e   :  { %2245 = vpow2.f32 %v1741_v25  ;;  %v1742_v29 = vmul.f32 -1.442695, %v1501_v28 }
 0x710   :  { %2247 = vpow2.f32 %v1742_v29 }
 0x71b   :  { %v2246_v42 = vpop.eup %2245 }
 0x71c   :  { %v1495_v52 = vadd.f32 1.0, %v2246_v42 }
 0x71d   :  { %v2248_v30 = vpop.eup %2247 }
 0x71e   :  { %2249 = vrcp.f32 %v1495_v52  ;;  %v1505_v31 = vadd.f32 1.0, %v2248_v30 }
 0x720   :  { %2251 = vrcp.f32 %v1505_v31 }
 0x72b   :  { %v2250_v32 = vpop.eup %2249 }
 0x72c   :  { %v1511_v51 = vmul.f32 %v2250_v32, %v1509_v48 }
 0x72d   :  { %v2252_v54 = vpop.eup %2251 }
 0x72e   :  { %v1512_v33 = vadd.f32 %v1511_v51, %v2720_v16  ;;  %v1514_v34 = vsub.f32 1.0, %v2252_v54  ;;  %v1518_v49 = vmul.f32 %v2252_v54, %v1516_v57 }
 0x730   :  { %2253 = vtanh.f32 %v1512_v33 }
 0x73d   :  { %v2254_v35 = vpop.eup %2253 }
 0x73e   :  { %v1515_v47 = vmul.f32 %v2254_v35, %v1514_v34 }
 0x740   :  { %v1519_v8 = vadd.f32 %v1518_v49, %v1515_v47 }
 0x742   :  { %v1521_v20 = vrot.slane %v1519_v8, 6  ;;  %v1707_v7 = vsel %vm1706_vm7, %v3224_v12, %v1519_v8  ;;  %v1692_v0 = vrot.slane %v1519_v8, 7 }
 0x744   :  { %1588 = vmatmul.mubr.f32.vlgmr.msra.gmra.mxu0 %v1521_v20  ;;  %2175 = vmatmul.mubr.f32.vlgmr.msra.gmra.mxu1 %v1521_v20 }
 0x804   :  { %v1589_v62 = vpop.f32.mrf.mxu0  ;;  %v1660_v5 = vpop.f32.mrf.mxu1 }
 0x805   :  { %v1590_v55 = vadd.f32 %v1589_v62, %v3399_v18  ;;  %v1661_v36 = vadd.f32 %v1660_v5, %v2717_v9 }
 0x806   :  { %v1591_v50 = vpop.f32.mrf.mxu0  ;;  %v2176_v2 = vpop.f32.mrf.mxu1 }
 0x807   :  { %v1665_v15 = vrot.slane %v1590_v55, 1  ;;  %v1592_v22 = vadd.f32 %v1591_v50, %v2709_v1  ;;  %v1685_v58 = vrot.slane %v1661_v36, 1 }
 0x809   :  { %v1667_v40 = vadd.f32 %v1665_v15, %v2707_v23  ;;  %v1675_v43 = vrot.slane %v1592_v22, 1 }
 0x80b   :  { %v1743_v46 = vmul.f32 -1.442695, %v1667_v40  ;;  %v1677_v44 = vadd.f32 %v1675_v43, %v2714_v61 }
 0x80d   :  { %2255 = vpow2.f32 %v1743_v46  ;;  %v1744_v37 = vmul.f32 -1.442695, %v1677_v44 }
 0x80f   :  { %2257 = vpow2.f32 %v1744_v37 }
 0x81a   :  { %v2256_v59 = vpop.eup %2255 }
 0x81b   :  { %v1671_v39 = vadd.f32 1.0, %v2256_v59 }
 0x81c   :  { %v2258_v38 = vpop.eup %2257 }
 0x81d   :  { %2259 = vrcp.f32 %v1671_v39  ;;  %v1681_v21 = vadd.f32 1.0, %v2258_v38 }
 0x81f   :  { %2261 = vrcp.f32 %v1681_v21 }
 0x82a   :  { %v2260_v41 = vpop.eup %2259 }
 0x82b   :  { %v1687_v12 = vmul.f32 %v2260_v41, %v1685_v58 }
 0x82c   :  { %v2262_v1 = vpop.eup %2261 }
 0x82d   :  { %v1688_v23 = vadd.f32 %v1687_v12, %v2720_v16  ;;  %v1690_v26 = vsub.f32 1.0, %v2262_v1  ;;  %v1694_v4 = vmul.f32 %v2262_v1, %v1692_v0 }
 0x82f   :  { %2263 = vtanh.f32 %v1688_v23 }
 0x83c   :  { %v2264_v61 = vpop.eup %2263 }
 0x83d   :  { %v1691_v3 = vmul.f32 %v2264_v61, %v1690_v26 }
 0x83f   :  { %v1695_v53 = vadd.f32 %v1694_v4, %v1691_v3 }
 0x841   :  { %v1709_v9 = vsel %vm1708_vm8, %v1707_v7, %v1695_v53 }
 0x842   :  { %1710 = vst [vmem:[#allocation8] sm:$0xff] %v1709_v9 }
 0x843   :  { %2384 = shalt.err (!%p2381_p5)
}
 0x844   :  { %1720 = dma.vmem_to_hbm [thread:$0]  %s1718_s5, 128, %s3314_s6, [#allocation4]  }
 0x845   :  { %2397 = dma.done.wait [#allocation4], 128  }
 0x846   :  { %2398 = vsyncadd [#allocation4], 4294967168 }
 0x847   :  { %1724 = vsyncpa [#allocation3], 1 }
 0x848   :  { %1725 = vsyncpa [#allocation6], 1 }
 0x849   :  { %1726 = vsyncpa [#allocation4], 1 }

</bundles_post_ra>
